<compile_context>
chip_gen: v7x
topology: tpu7x:2x2x1
jax: 0.10.0
libtpu: 0.0.40
codegen_flags: <defaults>
</compile_context>

<pallas_src>
import functools

import jax
import jax.numpy as jnp
from jax.experimental import pallas as pl
from jax.experimental.pallas import tpu as pltpu

LANE = 128


# ------------------------------ helpers ----------------------------------- #
def _round_up(v, m):
    return ((v + m - 1) // m) * m


def _pad2d(x, rows, cols):
    return jnp.pad(x, ((0, rows - x.shape[0]), (0, cols - x.shape[1])))


def _device_kind():
    try:
        return jax.devices()[0].device_kind.lower()
    except Exception:  # pragma: no cover
        return ""


def _vmem_capacity_bytes():
    """Physical VMEM per TensorCore (generation aware, robust fallback)."""
    try:
        info = pltpu.get_tpu_info()
        cap = getattr(info, "vmem_capacity_bytes", None)
        if cap:
            return int(cap)
    except Exception:  # pragma: no cover
        pass
    kind = _device_kind()
    if "v7" in kind:
        return 64 << 20
    return 128 << 20


def _vmem_budget():
    """(capacity, scoped-limit) — leave headroom for Mosaic internal scratch."""
    cap = _vmem_capacity_bytes()
    limit = max(32 << 20, min(cap - (24 << 20), 100 << 20))
    return cap, limit


def _tiled_n_pad(n):
    """Pad N so that >=256 tiles always divide it; prefer 512-multiples when
    the extra zero rows/cols are cheap (removes the 128-tile roofline cliff)."""
    n256 = _round_up(n, 256)
    n512 = _round_up(n, 512)
    return n512 if n512 <= int(n256 * 1.15) else n256


def _pick_tiles(n_pad, max_f_pad):
    """Generation-aware (tm, tk); both divide n_pad (a multiple of 256)."""
    kind = _device_kind()
    if "v6" in kind:
        tm_pref, tk_pref = 1024, 512     # 128 MiB VMEM: big row tiles
    elif "v5" in kind:
        tm_pref, tk_pref = 512, 512
    else:                                # v7x / unknown: 64 MiB VMEM
        tm_pref, tk_pref = 512, 512

    def fit(pref):
        t = min(pref, n_pad)
        while t > 256 and n_pad % t != 0:
            t //= 2
        return max(min(t, n_pad), 128)

    tm, tk = fit(tm_pref), fit(tk_pref)
    # Keep the (tm, f_out) f32 accumulator scratch modest.
    while tm > 256 and tm * max_f_pad * 4 > (8 << 20):
        tm //= 2
    return tm, tk


# ----------------------- fused all-layers kernel -------------------------- #
def _gcn_fused_kernel(a_ref, x_ref, d_ref, w_ref, b_ref, o_ref, xs_ref,
                      *, n_layers):
    """grid=(n_layers,): A/X/d stay VMEM-resident, W_i/b_i prefetch per layer,
    intermediate X lives in the bf16 VMEM scratch `xs_ref`."""
    layer = pl.program_id(0)

    @pl.when(layer == 0)
    def _():
        xs_ref[...] = x_ref[...]

    d = d_ref[...]                       # f32 [N, 1]  (ones if unnormalized)
    w = w_ref[0]                         # bf16 [maxF, maxF]
    b = b_ref[0]                         # f32  [1, maxF]

    # A_hat @ X @ W == diag(d) @ (A+I) @ diag(d) @ X @ W:
    #   scale (X @ W) rows by d_j, run the exact 0/1 bf16 (A+I) on the MXU,
    #   then scale output rows by d_i — all scaling in f32 on the VPU.
    xw = jnp.dot(xs_ref[...], w, preferred_element_type=jnp.float32)
    xw = (xw * d).astype(jnp.bfloat16)
    h = jnp.dot(a_ref[...], xw, preferred_element_type=jnp.float32)
    h = h * d + b

    h = jnp.where(layer < n_layers - 1, jnp.maximum(h, 0.0), h)
    xs_ref[...] = h.astype(jnp.bfloat16)

    @pl.when(layer == n_layers - 1)
    def _():
        o_ref[...] = h.astype(o_ref.dtype)


def _forward_fused(a_pad, x_pad, d_pad, w_stack, b_stack, n_layers, vmem_limit):
    n_pad = a_pad.shape[0]
    max_f = x_pad.shape[1]
    kernel = functools.partial(_gcn_fused_kernel, n_layers=n_layers)
    return pl.pallas_call(
        kernel,
        out_shape=jax.ShapeDtypeStruct((n_pad, max_f), jnp.float32),
        grid_spec=pltpu.PrefetchScalarGridSpec(
            num_scalar_prefetch=0,
            grid=(n_layers,),
            in_specs=[
                pl.BlockSpec((n_pad, n_pad), lambda l: (0, 0)),     # A (resident)
                pl.BlockSpec((n_pad, max_f), lambda l: (0, 0)),     # X0 (resident)
                pl.BlockSpec((n_pad, 1), lambda l: (0, 0)),         # d (resident)
                pl.BlockSpec((1, max_f, max_f), lambda l: (l, 0, 0)),  # W_l
                pl.BlockSpec((1, 1, max_f), lambda l: (l, 0, 0)),      # b_l
            ],
            out_specs=pl.BlockSpec((n_pad, max_f), lambda l: (0, 0)),
            scratch_shapes=[pltpu.VMEM((n_pad, max_f), jnp.bfloat16)],
        ),
        compiler_params=pltpu.CompilerParams(
            dimension_semantics=("arbitrary",),
            vmem_limit_bytes=vmem_limit,
        ),
    )(a_pad, x_pad, d_pad, w_stack, b_stack)


# --------------------- tiled per-layer kernels (large N) ------------------ #
def _xw_scale_kernel(x_ref, w_ref, d_ref, o_ref):
    """XW = d_j * (X @ W), written in bf16 (row-tiled, 'parallel')."""
    xw = jnp.dot(x_ref[...], w_ref[...], preferred_element_type=jnp.float32)
    o_ref[...] = (xw * d_ref[...]).astype(o_ref.dtype)


def _xw_scale(x, w, d, *, tm, vmem_limit):
    n, f_in = x.shape
    f_out = w.shape[1]
    return pl.pallas_call(
        _xw_scale_kernel,
        out_shape=jax.ShapeDtypeStruct((n, f_out), jnp.bfloat16),
        grid_spec=pltpu.PrefetchScalarGridSpec(
            num_scalar_prefetch=0,
            grid=(n // tm,),
            in_specs=[
                pl.BlockSpec((tm, f_in), lambda i: (i, 0)),
                pl.BlockSpec((f_in, f_out), lambda i: (0, 0)),
                pl.BlockSpec((tm, 1), lambda i: (i, 0)),
            ],
            out_specs=pl.BlockSpec((tm, f_out), lambda i: (i, 0)),
        ),
        compiler_params=pltpu.CompilerParams(
            dimension_semantics=("parallel",),
            vmem_limit_bytes=vmem_limit,
        ),
    )(x, w, d)


def _a_matmul_kernel(a_ref, xw_ref, d_ref, b_ref, o_ref, acc_ref, *, apply_relu):
    """Accumulate (A+I)_blk @ XW_blk over K; finalize d_i scaling + bias (+ReLU)."""
    k = pl.program_id(1)

    @pl.when(k == 0)
    def _():
        acc_ref[...] = jnp.zeros_like(acc_ref)

    acc_ref[...] += jnp.dot(a_ref[...], xw_ref[...],
                            preferred_element_type=jnp.float32)

    @pl.when(k == pl.num_programs(1) - 1)
    def _():
        h = acc_ref[...] * d_ref[...] + b_ref[...]
        if apply_relu:
            h = jnp.maximum(h, 0.0)
        o_ref[...] = h.astype(o_ref.dtype)


def _a_matmul(a, xw, d, b, *, apply_relu, out_dtype, tm, tk, vmem_limit):
    n = a.shape[0]
    f_out = xw.shape[1]
    kernel = functools.partial(_a_matmul_kernel, apply_relu=apply_relu)
    return pl.pallas_call(
        kernel,
        out_shape=jax.ShapeDtypeStruct((n, f_out), out_dtype),
        grid_spec=pltpu.PrefetchScalarGridSpec(
            num_scalar_prefetch=0,
            grid=(n // tm, n // tk),
            in_specs=[
                pl.BlockSpec((tm, tk), lambda i, k: (i, k)),
                pl.BlockSpec((tk, f_out), lambda i, k: (k, 0)),
                pl.BlockSpec((tm, 1), lambda i, k: (i, 0)),
                pl.BlockSpec((1, f_out), lambda i, k: (0, 0)),
            ],
            out_specs=pl.BlockSpec((tm, f_out), lambda i, k: (i, 0)),
            scratch_shapes=[pltpu.VMEM((tm, f_out), jnp.float32)],
        ),
        compiler_params=pltpu.CompilerParams(
            dimension_semantics=("parallel", "arbitrary"),
            vmem_limit_bytes=vmem_limit,
        ),
    )(a, xw, d, b)


def _forward_tiled(a_pad, x_pad, d_pad, padded_params, relu_flags,
                   tm, tk, vmem_limit):
    cur = x_pad
    out = None
    n_layers = len(padded_params)
    for i, (w, b) in enumerate(padded_params):
        xw = _xw_scale(cur, w, d_pad, tm=tm, vmem_limit=vmem_limit)
        is_last = i == n_layers - 1
        out = _a_matmul(
            a_pad, xw, d_pad, b,
            apply_relu=relu_flags[i],
            out_dtype=jnp.float32 if is_last else jnp.bfloat16,  # bf16 writeback
            tm=tm, tk=tk, vmem_limit=vmem_limit)
        cur = out
    return out


# --------------------------- model / forward ------------------------------ #
def init_gcn_params(key, layer_dims):
    """Deterministic Glorot-uniform init for each (W, b) pair."""
    params = []
    for i, (fan_in, fan_out) in enumerate(zip(layer_dims[:-1], layer_dims[1:])):
        k = jax.random.fold_in(key, i)
        limit = jnp.sqrt(6.0 / (fan_in + fan_out))
        w = jax.random.uniform(
            k, (fan_in, fan_out), dtype=jnp.float32, minval=-limit, maxval=limit)
        b = jnp.zeros((fan_out,), dtype=jnp.float32)
        params.append((w, b))
    return params


def add_self_loops_and_degree(adj):
    """Returns (A + I, d) with d = deg^-1/2, so A_hat = diag(d)(A+I)diag(d)."""
    n = adj.shape[0]
    a = adj + jnp.eye(n, dtype=adj.dtype)
    deg = jnp.sum(a, axis=1)
    d_inv_sqrt = jnp.where(deg > 0, 1.0 / jnp.sqrt(deg), 0.0)
    return a, d_inv_sqrt


def normalize_adjacency(adj):
    """Dense A_hat = D^-1/2 (A + I) D^-1/2 (for the generic interface / ref)."""
    a, d = add_self_loops_and_degree(adj)
    return a * d[:, None] * d[None, :]


def graph_convolutional_network(inputs, params, *, deg_inv_sqrt=None,
                                force_tiled=False):
    """Forward pass mirroring the PyTorch module: returns only x.

    inputs = (adjacency, x).  If `deg_inv_sqrt` is given, `adjacency` is the
    raw (A + I) matrix (exact 0/1 in bf16) and the D^-1/2 scaling is applied
    on-chip; otherwise `adjacency` is used as-is (e.g. a pre-normalized A_hat).
    """
    adj, x = inputs
    n, f_in = x.shape
    n_layers = len(params)
    f_dims = [f_in] + [w.shape[1] for (w, _) in params]
    f_pads = [_round_up(f, LANE) for f in f_dims]
    max_f = max(f_pads)
    relu_flags = [i < n_layers - 1 for i in range(n_layers)]

    _, vmem_limit = _vmem_budget()

    # Fused working-set estimate (double buffers + in-kernel f32 temporaries).
    n_pad_fused = _round_up(n, LANE)
    fused_bytes = (
        2 * n_pad_fused * n_pad_fused * 2           # A bf16 (x2 buffers)
        + n_pad_fused * max_f * (2 * 2 + 2 * 4 + 2 + 2 * 4)  # X, out, scratch, temps
        + 4 * max_f * max_f * 2                     # W block buffers
        + 8 * max_f * 4                             # bias blocks
    )
    use_fused = (not force_tiled) and fused_bytes <= int(0.7 * vmem_limit)

    if use_fused:
        n_pad = n_pad_fused
        tm = tk = None
    else:
        n_pad = _tiled_n_pad(n)
        tm, tk = _pick_tiles(n_pad, max_f)

    a_pad = _pad2d(adj, n_pad, n_pad).astype(jnp.bfloat16)
    if deg_inv_sqrt is None:
        d_pad = jnp.ones((n_pad, 1), dtype=jnp.float32)
    else:
        d_pad = jnp.pad(deg_inv_sqrt.reshape(-1).astype(jnp.float32),
                        (0, n_pad - n)).reshape(n_pad, 1)

    if use_fused:
        x_pad = _pad2d(x, n_pad, max_f).astype(jnp.bfloat16)
        w_stack = jnp.stack(
            [_pad2d(w, max_f, max_f) for (w, _) in params]).astype(jnp.bfloat16)
        b_stack = jnp.stack(
            [jnp.pad(b, (0, max_f - b.shape[0])).reshape(1, max_f)
             for (_, b) in params]).astype(jnp.float32)
        out_pad = _forward_fused(a_pad, x_pad, d_pad, w_stack, b_stack,
                                 n_layers, vmem_limit)
    else:
        x_pad = _pad2d(x, n_pad, f_pads[0]).astype(jnp.bfloat16)
        padded_params = []
        for i, (w, b) in enumerate(params):
            w_pad = _pad2d(w, f_pads[i], f_pads[i + 1]).astype(jnp.bfloat16)
            b_pad = jnp.pad(b, (0, f_pads[i + 1] - b.shape[0]))
            b_pad = b_pad.reshape(1, -1).astype(jnp.float32)
            padded_params.append((w_pad, b_pad))
        out_pad = _forward_tiled(a_pad, x_pad, d_pad, padded_params,
                                 relu_flags, tm, tk, vmem_limit)

    return out_pad[:n, : f_dims[-1]]


# ------------------------------ reference --------------------------------- #
def graph_convolutional_network_ref(inputs, params):
    adj, x = inputs
    n_layers = len(params)
    for i, (w, b) in enumerate(params):
        h = adj @ x @ w + b[None, :]
        x = jnp.maximum(h, 0.0) if i < n_layers - 1 else h
    return x


# --------------------------------- main ------------------------------------ #
if __name__ == "__main__":
    key = jax.random.PRNGKey(0)
    k_adj, k_feat, k_params = jax.random.split(key, 3)

    num_nodes = 200
    feat_in, hidden, feat_out = 32, 32, 16

    # Deterministic random undirected graph + features.
    raw = jax.random.uniform(k_adj, (num_nodes, num_nodes), dtype=jnp.float32)
    adj = (((raw + raw.T) * 0.5) > 0.85).astype(jnp.float32)

    a_loops, d_inv_sqrt = add_self_loops_and_degree(adj)
    adj_norm = a_loops * d_inv_sqrt[:, None] * d_inv_sqrt[None, :]

    feats = jax.random.normal(k_feat, (num_nodes, feat_in), dtype=jnp.float32)
    params = init_gcn_params(k_params, (feat_in, hidden, feat_out))

    # Fused single-kernel path with on-chip degree normalization
    # (exact 0/1 bf16 (A+I) on the MXU, f32 scaling on the VPU).
    out_fused = graph_convolutional_network((a_loops, feats), params,
                                            deg_inv_sqrt=d_inv_sqrt)
    out_fused = jax.block_until_ready(out_fused)

    # Tiled path, forced (exercises the large-N code path end-to-end).
    out_tiled = graph_convolutional_network((a_loops, feats), params,
                                            deg_inv_sqrt=d_inv_sqrt,
                                            force_tiled=True)
    out_tiled = jax.block_until_ready(out_tiled)

    # Generic interface: pre-normalized dense adjacency, no degree vector.
    out_generic = graph_convolutional_network((adj_norm, feats), params)
    out_generic = jax.block_until_ready(out_generic)

    ref = graph_convolutional_network_ref((adj_norm, feats), params)

    assert out_fused.shape == (num_nodes, feat_out)
    assert out_tiled.shape == (num_nodes, feat_out)
    assert out_generic.shape == (num_nodes, feat_out)
    # bf16 matmul operands with f32 accumulation -> ~1e-3..1e-2 deviation from
    # the pure-f32 reference; tolerance sized accordingly.
    assert jnp.allclose(out_fused, ref, atol=3e-2, rtol=3e-2)
    assert jnp.allclose(out_tiled, ref, atol=3e-2, rtol=3e-2)
    assert jnp.allclose(out_generic, ref, atol=3e-2, rtol=3e-2)
    assert jnp.allclose(out_fused, out_tiled, atol=2e-2, rtol=2e-2)

    print("KERNEL_OK")
</pallas_src>

<mosaic_0001>
module attributes {stable_mosaic.version = 11 : i64} {
  func.func @_gcn_fused_kernel(%arg0: i32, %arg1: memref<256x256xbf16, #tpu.memory_space<vmem>>, %arg2: memref<256x128xbf16, #tpu.memory_space<vmem>>, %arg3: memref<256x1xf32, #tpu.memory_space<vmem>>, %arg4: memref<1x128x128xbf16, #tpu.memory_space<vmem>>, %arg5: memref<1x1x128xf32, #tpu.memory_space<vmem>>, %arg6: memref<256x128xf32, #tpu.memory_space<vmem>>, %arg7: memref<256x128xbf16, #tpu.memory_space<vmem>>) attributes {dimension_semantics = [#tpu.dimension_semantics<arbitrary>], iteration_bounds = array<i64: 2>, scalar_prefetch = 0 : i64, scratch_operands = 1 : i64, tpu.core_type = #tpu.core_type<tc>, window_params = [{pipeline_mode = #tpu.pipeline_mode<synchronous>, transform_indices = @transform_0, window_bounds = array<i64: 256, 256>}, {pipeline_mode = #tpu.pipeline_mode<synchronous>, transform_indices = @transform_1, window_bounds = array<i64: 256, 128>}, {pipeline_mode = #tpu.pipeline_mode<synchronous>, transform_indices = @transform_2, window_bounds = array<i64: 256, 1>}, {transform_indices = @transform_3, window_bounds = array<i64: 1, 128, 128>}, {transform_indices = @transform_4, window_bounds = array<i64: 1, 1, 128>}, {pipeline_mode = #tpu.pipeline_mode<synchronous>, transform_indices = @transform_5, window_bounds = array<i64: 256, 128>}]} {
    %c0_i32 = arith.constant 0 : i32
    %0 = arith.cmpi eq, %arg0, %c0_i32 : i32
    %1 = arith.extui %0 : i1 to i32
    %c0_i32_0 = arith.constant 0 : i32
    %2 = arith.cmpi ne, %1, %c0_i32_0 : i32
    scf.if %2 {
      %c0_18 = arith.constant 0 : index
      %c0_19 = arith.constant 0 : index
      %28 = vector.load %arg2[%c0_18, %c0_19] : memref<256x128xbf16, #tpu.memory_space<vmem>>, vector<256x128xbf16>
      %c0_20 = arith.constant 0 : index
      %c0_21 = arith.constant 0 : index
      %29 = vector.load %arg7[%c0_20, %c0_21] : memref<256x128xbf16, #tpu.memory_space<vmem>>, vector<256x128xbf16>
      tpu.vector_store %arg7[%c0_20, %c0_21], %28 {strides = array<i32>} : memref<256x128xbf16, #tpu.memory_space<vmem>>, vector<256x128xbf16>,
    } else {
    }
    %c0 = arith.constant 0 : index
    %c0_1 = arith.constant 0 : index
    %3 = vector.load %arg3[%c0, %c0_1] : memref<256x1xf32, #tpu.memory_space<vmem>>, vector<256x1xf32>
    %c0_2 = arith.constant 0 : index
    %c0_3 = arith.constant 0 : index
    %c0_4 = arith.constant 0 : index
    %4 = vector.load %arg4[%c0_2, %c0_3, %c0_4] : memref<1x128x128xbf16, #tpu.memory_space<vmem>>, vector<1x128x128xbf16>
    %5 = vector.shape_cast %4 : vector<1x128x128xbf16> to vector<128x128xbf16>
    %c0_5 = arith.constant 0 : index
    %c0_6 = arith.constant 0 : index
    %c0_7 = arith.constant 0 : index
    %6 = vector.load %arg5[%c0_5, %c0_6, %c0_7] : memref<1x1x128xf32, #tpu.memory_space<vmem>>, vector<1x1x128xf32>
    %7 = vector.shape_cast %6 : vector<1x1x128xf32> to vector<1x128xf32>
    %c0_8 = arith.constant 0 : index
    %c0_9 = arith.constant 0 : index
    %8 = vector.load %arg7[%c0_8, %c0_9] : memref<256x128xbf16, #tpu.memory_space<vmem>>, vector<256x128xbf16>
    %cst = arith.constant dense<0.000000e+00> : vector<256x128xf32>
    %9 = tpu.matmul %8, %5, %cst {dimension_numbers = #tpu.dot_dimension_numbers<[1], [0], [0], [1], [0, 0, 1, 1], [], []>} : vector<256x128xbf16>, vector<128x128xbf16>, vector<256x128xf32> -> vector<256x128xf32>
    %10 = vector.broadcast %3 : vector<256x1xf32> to vector<256x128xf32>
    %11 = arith.mulf %9, %10 : vector<256x128xf32>
    %12 = arith.truncf %11 : vector<256x128xf32> to vector<256x128xbf16>
    %c0_10 = arith.constant 0 : index
    %c0_11 = arith.constant 0 : index
    %13 = vector.load %arg1[%c0_10, %c0_11] : memref<256x256xbf16, #tpu.memory_space<vmem>>, vector<256x256xbf16>
    %cst_12 = arith.constant dense<0.000000e+00> : vector<256x128xf32>
    %14 = tpu.matmul %13, %12, %cst_12 {dimension_numbers = #tpu.dot_dimension_numbers<[1], [0], [0], [1], [0, 0, 1, 1], [], []>} : vector<256x256xbf16>, vector<256x128xbf16>, vector<256x128xf32> -> vector<256x128xf32>
    %15 = vector.broadcast %3 : vector<256x1xf32> to vector<256x128xf32>
    %16 = arith.mulf %14, %15 : vector<256x128xf32>
    %17 = vector.broadcast %7 : vector<1x128xf32> to vector<256x128xf32>
    %18 = arith.addf %16, %17 : vector<256x128xf32>
    %c1_i32 = arith.constant 1 : i32
    %19 = arith.cmpi slt, %arg0, %c1_i32 : i32
    %cst_13 = arith.constant 0.000000e+00 : f32
    %20 = vector.broadcast %cst_13 : f32 to vector<256x128xf32>
    %21 = arith.maximumf %18, %20 : vector<256x128xf32>
    %22 = arith.select %19, %21, %18 : vector<256x128xf32>
    %23 = arith.truncf %22 : vector<256x128xf32> to vector<256x128xbf16>
    %c0_14 = arith.constant 0 : index
    %c0_15 = arith.constant 0 : index
    %24 = vector.load %arg7[%c0_14, %c0_15] : memref<256x128xbf16, #tpu.memory_space<vmem>>, vector<256x128xbf16>
    tpu.vector_store %arg7[%c0_14, %c0_15], %23 {strides = array<i32>} : memref<256x128xbf16, #tpu.memory_space<vmem>>, vector<256x128xbf16>,
    %c1_i32_16 = arith.constant 1 : i32
    %25 = arith.cmpi eq, %arg0, %c1_i32_16 : i32
    %26 = arith.extui %25 : i1 to i32
    %c0_i32_17 = arith.constant 0 : i32
    %27 = arith.cmpi ne, %26, %c0_i32_17 : i32
    scf.if %27 {
      %c0_18 = arith.constant 0 : index
      %c0_19 = arith.constant 0 : index
      %28 = vector.load %arg6[%c0_18, %c0_19] : memref<256x128xf32, #tpu.memory_space<vmem>>, vector<256x128xf32>
      tpu.vector_store %arg6[%c0_18, %c0_19], %22 {strides = array<i32>} : memref<256x128xf32, #tpu.memory_space<vmem>>, vector<256x128xf32>,
    } else {
    }
    return
  }
  func.func @transform_0(%arg0: i32) -> (i32, i32) {
    %c0_i32 = arith.constant 0 : i32
    %c0_i32_0 = arith.constant 0 : i32
    %c0_i32_1 = arith.constant 0 : i32
    return %c0_i32, %c0_i32_0 : i32, i32
  }
  func.func @transform_1(%arg0: i32) -> (i32, i32) {
    %c0_i32 = arith.constant 0 : i32
    %c0_i32_0 = arith.constant 0 : i32
    %c0_i32_1 = arith.constant 0 : i32
    return %c0_i32, %c0_i32_0 : i32, i32
  }
  func.func @transform_2(%arg0: i32) -> (i32, i32) {
    %c0_i32 = arith.constant 0 : i32
    %c0_i32_0 = arith.constant 0 : i32
    %c0_i32_1 = arith.constant 0 : i32
    return %c0_i32, %c0_i32_0 : i32, i32
  }
  func.func @transform_3(%arg0: i32) -> (i32, i32, i32) {
    %c0_i32 = arith.constant 0 : i32
    %c0_i32_0 = arith.constant 0 : i32
    %c0_i32_1 = arith.constant 0 : i32
    return %arg0, %c0_i32, %c0_i32_0 : i32, i32, i32
  }
  func.func @transform_4(%arg0: i32) -> (i32, i32, i32) {
    %c0_i32 = arith.constant 0 : i32
    %c0_i32_0 = arith.constant 0 : i32
    %c0_i32_1 = arith.constant 0 : i32
    return %arg0, %c0_i32, %c0_i32_0 : i32, i32, i32
  }
  func.func @transform_5(%arg0: i32) -> (i32, i32) {
    %c0_i32 = arith.constant 0 : i32
    %c0_i32_0 = arith.constant 0 : i32
    %c0_i32_1 = arith.constant 0 : i32
    return %c0_i32, %c0_i32_0 : i32, i32
  }
}

</mosaic_0001>

<bundles_post_ra>
// kernel: tpu_custom_call.1
= control target key start
LH: loop header
LB: loop body
LE: loop exit
PB: predicated region body
PF: predicated region fallthrough
CT: control target
= control target key end

     0   :  { %s2931_s0 = inlined_call_operand.hbm [shape: bf16[256,256], index: 0, kind: input, shape index: {}]   ;;  %s2932_s1 = inlined_call_operand.hbm [shape: bf16[256,128], index: 1, kind: input, shape index: {}]   ;;  %s2933_s2 = inlined_call_operand.hbm [shape: f32[256,1], index: 2, kind: input, shape index: {}]   ;;  %s2934_s3 = inlined_call_operand.hbm [shape: bf16[2,128,128], index: 3, kind: input, shape index: {}]   ;;  %s2935_s4 = inlined_call_operand.hbm [shape: f32[2,1,128], index: 4, kind: input, shape index: {}]   ;;  %s2936_s5 = inlined_call_operand.hbm [shape: f32[256,128], index: 5, kind: output, shape index: {}]  }
   0x1   :  { %2946 = sst [smem:[#allocation17_spill]] %s2932_s1 }
   0x2   :  { %2947 = sst [smem:[#allocation18_spill]] %s2934_s3 }
   0x3   :  { %10 = vsyncpa [#allocation4], 0 }
   0x4   :  { %11 = vsyncpa [#allocation7], 0 }
   0x5   :  { %12 = vsyncpa [#allocation10], 0 }
   0x6   :  { %14 = vsyncpa [#allocation10 + $0x1], 0 }
   0x7   :  { %15 = vsyncpa [#allocation5], 0  ;;  %s2306_s18 = smov 0   ;;  %s2308_s19 = smov 0  }
   0x8   :  { %s2310_s20 = smov 0   ;;  %s2312_s21 = smov 0  }
   0x9 LB: > { %s2325_s22 = sadd.s32 4294967295, %s2261_s21   ;;  %p104_p0 = scmp.ne.s32.totalorder %s2253_s19, %s2249_s18  ;;  %s2261_s21 = sphi %s2312_s21, %s2972_s21   ;;  %s2257_s20 = sphi %s2310_s20, %s2971_s20   ;;  %s2253_s19 = sphi %s2308_s19, %s2970_s19   ;;  %s2249_s18 = sphi %s2306_s18, %s2969_s18  }
   0xa   : > { %p2937_p1 = scmp.eq.s32.totalorder %s2325_s22, 0  ;;  %p1604_p2 = scmp.ge.s32.totalorder %s2261_s21, 1 }
   0xb   : > { %p162_p3 = scmp.lt.s32.totalorder %s2261_s21, 3  ;;  %s2263_s25 = smov [#allocation6]  }
   0xc   : > { %p2334_p5 = por %p2937_p1, %p104_p0  ;;  %s187_s26 = sshll.u32 %s2263_s25, 4  ;;  %s188_s26 = int_to_ptr.vmem [resolvable:$true] %s187_s26 }
   0xd   : > { %p2338_p6 = pnand %p1604_p2, %p162_p3  ;;  %s2351_s28 = sadd.s32 1, %s2261_s21  }
   0xe   : > { %s2948_s23 = scalar_select %p2334_p5, 1, 0 }
   0xf   : > { %s2949_s24 = scalar_select %p2338_p6, 1, 0 }
  0x10   : > { %p1902_p7 = pneg %p2338_p6  ;;  %s91_s29 = sadd.s32 1, %s2257_s20 }
  0x11   : > { %s88_s30 = ssub.s32 %s2261_s21, %s2351_s28  ;;  %s2951_s1 = sld [smem:[#allocation17_spill]] }
  0x12   : > { %p2346_p8 = pnand %p1902_p7, %p2937_p1 }
  0x14   : > { %s2950_s27 = scalar_select %p2346_p8, 1, 0 }
  0x15   : > { %p2364_p10 = pneg %p2346_p8 }
  0x17   : > { %s2045_s8 = scalar_lea.hbm %s2951_s1, 2048 }
  0x18   : > { %p2046_p9 = scmp.ne.s32.totalorder %s2951_s1, %s2045_s8  ;;  %p2052_p13 = scmp.lt.u32.totalorder %s2045_s8, %s2951_s1 }
  0x1a   : > { %p2048_p11 = pnand %p2364_p10, %p2046_p9 }
  0x1c   : > { %p2049_p12 = pneg %p2048_p11 }
  0x1e   : > { %p2054_p0 = pnand %p2052_p13, %p2049_p12 }
  0x20   : > { %2057 = shalt.err (!%p2054_p0)
}
  0x21   : > { %s2058_s14 = scalar_lea.vmem %s188_s26, 2048  ;;  %p2066_p4 = scmp.lt.s32.totalorder %s188_s26, %s188_s26 }
  0x22   : > { %p2059_p2 = scmp.ne.s32.totalorder %s188_s26, %s2058_s14  ;;  %p2067_p1 = scmp.lt.s32.totalorder %s2058_s14, %s2058_s14 }
  0x24   : > { %p2061_p3 = pnand %p2059_p2, %p2364_p10  ;;  %p2068_p5 = por %p2067_p1, %p2066_p4 }
  0x26   : > { %p2062_p7 = pneg %p2061_p3 }
  0x28   : > { %p2069_p6 = pnand %p2068_p5, %p2062_p7 }
  0x2a   : > { %2072 = shalt.err (!%p2069_p6)
}
  0x2b   : > { %s2264_s15 = smov 64   ;;  %s2265_s16 = smov 4  }
  0x2c   : > { %1908 = dma.hbm_to_vmem [thread:$0]  (!%p2346_p8), %s2951_s1, 2048, %s188_s26, [#allocation7], %s2264_s15, %s2264_s15, %s2265_s16  }
  0x2d   : > { %p89_p1 = scmp.eq.s32.totalorder %s88_s30, 0  ;;  %p98_p4 = scmp.ne.s32.totalorder %s2257_s20, %s2253_s19 }
  0x2e   : > { %p99_p5 = scmp.eq.s32.totalorder %s2261_s21, 0  ;;  %p1922_p6 = scmp.lt.s32.totalorder %s2261_s21, 2 }
  0x2f   : > { %s2388_s25 = scalar_select %p89_p1, %s2257_s20, %s91_s29  }
  0x30   : > { %p100_p9 = por %p99_p5, %p98_p4  ;;  %s214_s6 = sand.u32 1, %s2261_s21  }
  0x31   : > { %s2940_s7 = sand.u32 1, %s2257_s20   ;;  %s1681_s9 = sshll.u32 %s2261_s21, 10 }
  0x32   : > { %s1609_s8 = sshll.u32 %s2940_s7, 6  ;;  %s2953_s3 = sld [smem:[#allocation18_spill]] }
  0x33   : > { %s218_s26 = scalar_lea.vmem [#allocation9], %s1609_s8  ;;  %p2400_p11 = pnand %p1922_p6, %p100_p9 }
  0x34   : > { %s225_s30 = sshll.u32 %s218_s26, 4  ;;  %s2266_s14 = smov [#allocation3]   ;;  %s2404_s30 = int_to_ptr.vmem [resolvable:$true] %s225_s30 }
  0x35   : > { %s2954_s29 = scalar_select %p2400_p11, 1, 0 }
  0x36   : > { %s2406_s17 = sshll.u32 %s2266_s14, 4  ;;  %s2408_s18 = scalar_lea.sflag [#allocation10], %s214_s6  ;;  %s175_s17 = int_to_ptr.vmem [resolvable:$true] %s2406_s17 }
  0x37   : > { %p2943_p13 = pneg %p2400_p11 }
  0x38   : > { %s2398_s13 = scalar_lea.hbm %s2953_s3, %s1681_s9  ;;  %s2078_s12 = scalar_lea.hbm %s2953_s3, 2048 }
  0x39   : > { %s2073_s9 = scalar_lea.hbm %s2398_s13, 1024  ;;  %p2079_p3 = scmp.lt.u32.totalorder %s2398_s13, %s2953_s3 }
  0x3a   : > { %p2074_p12 = scmp.ne.s32.totalorder %s2398_s13, %s2073_s9  ;;  %p2080_p7 = scmp.lt.u32.totalorder %s2078_s12, %s2073_s9 }
  0x3b   : > { %p2082_p4 = scmp.lt.u32.totalorder %s2073_s9, %s2398_s13 }
  0x3c   : > { %p2076_p0 = pnand %p2943_p13, %p2074_p12  ;;  %p2081_p1 = por %p2080_p7, %p2079_p3 }
  0x3e   : > { %p2077_p2 = pneg %p2076_p0  ;;  %p2083_p5 = por %p2082_p4, %p2081_p1 }
  0x40   : > { %p2084_p6 = pnand %p2083_p5, %p2077_p2 }
  0x42   : > { %2087 = shalt.err (!%p2084_p6)
}
  0x43   : > { %s2088_s6 = scalar_lea.vmem %s2404_s30, 1024  ;;  %s2267_s14 = smov [#allocation9]  }
  0x44   : > { %p2089_p9 = scmp.ne.s32.totalorder %s2404_s30, %s2088_s6  ;;  %s2093_s8 = sshll.u32 %s2267_s14, 4  ;;  %s2094_s8 = int_to_ptr.vmem [resolvable:$false] %s2093_s8 }
  0x45   : > { %s2095_s7 = scalar_lea.vmem %s2094_s8, 2048  ;;  %p2096_p8 = scmp.lt.s32.totalorder %s2404_s30, %s2094_s8 }
  0x46   : > { %p2091_p12 = pnand %p2089_p9, %p2943_p13  ;;  %p2097_p3 = scmp.lt.s32.totalorder %s2095_s7, %s2088_s6 }
  0x48   : > { %p2092_p0 = pneg %p2091_p12  ;;  %p2098_p7 = por %p2097_p3, %p2096_p8 }
  0x4a   : > { %p2099_p1 = pnand %p2098_p7, %p2092_p0 }
  0x4c   : > { %2102 = shalt.err (!%p2099_p1)
}
  0x4d   : > { %1915 = dma.hbm_to_vmem [thread:$0]  (!%p2400_p11), %s2398_s13, 1024, %s2404_s30, %s2408_s18, %s2264_s15, %s2264_s15, %s2265_s16  }
  0x4e   : > { %s2103_s12 = scalar_lea.hbm %s2931_s0, 4096 }
  0x4f   : > { %p2104_p8 = scmp.ne.s32.totalorder %s2931_s0, %s2103_s12  ;;  %p2110_p5 = scmp.lt.u32.totalorder %s2103_s12, %s2931_s0 }
  0x51   : > { %p2106_p2 = pnand %p2104_p8, %p2364_p10 }
  0x53   : > { %p2107_p4 = pneg %p2106_p2 }
  0x55   : > { %p2112_p6 = pnand %p2110_p5, %p2107_p4 }
  0x57   : > { %2115 = shalt.err (!%p2112_p6)
}
  0x58   : > { %s2116_s7 = scalar_lea.vmem %s175_s17, 4096  ;;  %p2124_p3 = scmp.lt.s32.totalorder %s175_s17, %s175_s17 }
  0x59   : > { %p2117_p9 = scmp.ne.s32.totalorder %s175_s17, %s2116_s7  ;;  %p2125_p7 = scmp.lt.s32.totalorder %s2116_s7, %s2116_s7 }
  0x5b   : > { %p2119_p12 = pnand %p2117_p9, %p2364_p10  ;;  %p2126_p1 = por %p2125_p7, %p2124_p3 }
  0x5d   : > { %p2120_p0 = pneg %p2119_p12 }
  0x5f   : > { %p2127_p13 = pnand %p2126_p1, %p2120_p0 }
  0x61   : > { %2130 = shalt.err (!%p2127_p13)
}
  0x62   : > { %s2268_s15 = smov 128   ;;  %s2269_s16 = smov 8  }
  0x63   : > { %p2955_p8 = scmp.ne.s32.totalorder %s2950_s27, 0  ;;  %s2270_s9 = smov [#allocation8]  }
  0x64   : > { %s200_s10 = sshll.u32 %s2270_s9, 4  ;;  %s1612_s12 = sshll.u32 %s2261_s21, 4  ;;  %s201_s10 = int_to_ptr.vmem [resolvable:$true] %s200_s10 }
  0x65   : > { %1905 = dma.hbm_to_vmem [thread:$0]  (!%p2955_p8), %s2931_s0, 4096, %s175_s17, [#allocation4], %s2268_s15, %s2268_s15, %s2269_s16  }
  0x66   : > { %s2131_s14 = scalar_lea.hbm %s2933_s2, 4096 }
  0x67   : > { %p2132_p13 = scmp.ne.s32.totalorder %s2933_s2, %s2131_s14  ;;  %p2138_p5 = scmp.lt.u32.totalorder %s2131_s14, %s2933_s2 }
  0x69   : > { %p2134_p2 = pnand %p2132_p13, %p2364_p10 }
  0x6b   : > { %p2135_p4 = pneg %p2134_p2 }
  0x6d   : > { %p2140_p6 = pnand %p2138_p5, %p2135_p4 }
  0x6f   : > { %2143 = shalt.err (!%p2140_p6)
}
  0x70   : > { %s2144_s17 = scalar_lea.vmem %s201_s10, 4096  ;;  %p2152_p3 = scmp.lt.s32.totalorder %s201_s10, %s201_s10 }
  0x71   : > { %p2145_p9 = scmp.ne.s32.totalorder %s201_s10, %s2144_s17  ;;  %p2153_p7 = scmp.lt.s32.totalorder %s2144_s17, %s2144_s17 }
  0x73   : > { %p2147_p12 = pnand %p2145_p9, %p2364_p10  ;;  %p2154_p1 = por %p2153_p7, %p2152_p3 }
  0x75   : > { %p2148_p0 = pneg %p2147_p12 }
  0x77   : > { %p2155_p11 = pnand %p2154_p1, %p2148_p0 }
  0x79   : > { %2158 = shalt.err (!%p2155_p11)
}
  0x7a   : > { %1911 = dma.hbm_to_vmem [thread:$0]  (!%p2955_p8), %s2933_s2, 4096, %s201_s10, [#allocation7], %s2268_s15, %s2268_s15, %s2269_s16  }
  0x7b   : > { %s2480_s30 = scalar_lea.hbm %s2935_s4, %s1612_s12  ;;  %s2956_s11 = sand.u32 1, %s2257_s20  }
  0x7c   : > { %s238_s9 = scalar_lea.vmem [#allocation11], %s2956_s11  ;;  %s2159_s27 = scalar_lea.hbm %s2480_s30, 16 }
  0x7d   : > { %s245_s26 = sshll.u32 %s238_s9, 4  ;;  %p2160_p10 = scmp.ne.s32.totalorder %s2480_s30, %s2159_s27  ;;  %s246_s26 = int_to_ptr.vmem [resolvable:$true] %s245_s26 }
  0x7e   : > { %p2957_p11 = scmp.ne.s32.totalorder %s2954_s29, 0  ;;  %s2164_s10 = scalar_lea.hbm %s2935_s4, 32 }
  0x7f   : > { %p2165_p8 = scmp.lt.u32.totalorder %s2480_s30, %s2935_s4  ;;  %p2166_p5 = scmp.lt.u32.totalorder %s2164_s10, %s2159_s27 }
  0x80   : > { %p2958_p13 = pneg %p2957_p11  ;;  %p2168_p9 = scmp.lt.u32.totalorder %s2159_s27, %s2480_s30 }
  0x81   : > { %p2167_p6 = por %p2166_p5, %p2165_p8 }
  0x82   : > { %p2162_p2 = pnand %p2160_p10, %p2958_p13 }
  0x83   : > { %p2169_p12 = por %p2168_p9, %p2167_p6 }
  0x84   : > { %p2163_p4 = pneg %p2162_p2 }
  0x86   : > { %p2170_p0 = pnand %p2169_p12, %p2163_p4 }
  0x88   : > { %2173 = shalt.err (!%p2170_p0)
}
  0x89   : > { %s2174_s14 = scalar_lea.vmem %s246_s26, 16  ;;  %p2959_p7 = pmov %p2958_p13 }
  0x8a   : > { %p2175_p3 = scmp.ne.s32.totalorder %s246_s26, %s2174_s14  ;;  %s2271_s8 = smov [#allocation11]  }
  0x8b   : > { %s2179_s7 = sshll.u32 %s2271_s8, 4  ;;  %s2180_s7 = int_to_ptr.vmem [resolvable:$false] %s2179_s7 }
  0x8c   : > { %p2177_p1 = pnand %p2175_p3, %p2959_p7  ;;  %s2181_s17 = scalar_lea.vmem %s2180_s7, 32 }
  0x8d   : > { %p2182_p13 = scmp.lt.s32.totalorder %s246_s26, %s2180_s7  ;;  %p2183_p2 = scmp.lt.s32.totalorder %s2181_s17, %s2174_s14 }
  0x8e   : > { %p2178_p10 = pneg %p2177_p1 }
  0x8f   : > { %p2184_p5 = por %p2183_p2, %p2182_p13 }
  0x91   : > { %p2185_p8 = pnand %p2184_p5, %p2178_p10 }
  0x93   : > { %2188 = shalt.err (!%p2185_p8)
}
  0x94   : > { %1918 = dma.hbm_to_vmem [thread:$0]  (!%p2957_p11), %s2480_s30, 16, %s246_s26, %s2408_s18  }
  0x95   : > { %p2960_p4 = scmp.ne.s32.totalorder %s2949_s24, 0 }
  0x96   : > { %p2961_p6 = scmp.eq.s32.totalorder (!%p2960_p4), %s2325_s22, 0 }
  0x97   : > { %254 = sbr.rel (%p2960_p4) target bundleno = 835 (0x343), region = 40 }
  0x9e   : > { %2232 = dma.done.wait (%p2961_p6), [#allocation4], 4096   ;;  %p2962_p9 = pmov %p2961_p6 }
  0x9f   : > { %p2963_p12 = pmov %p2961_p6 }
  0xa0   : > { %2234 = vsyncadd (%p2962_p9), [#allocation4], 4294963200 }
  0xa1   : > { %2236 = dma.done.wait (%p2963_p12), [#allocation7], 6144   ;;  %p2964_p0 = pmov %p2961_p6 }
  0xa2   : > { %s268_s29 = sand.u32 1, %s2325_s22   ;;  %s270_s18 = sand.u32 1, %s2253_s19  }
  0xa3   : > { %2238 = vsyncadd (%p2964_p0), [#allocation7], 4294961152  ;;  %s1617_s21 = sshll.u32 %s270_s18, 6  ;;  %s269_s24 = scalar_lea.sflag [#allocation10], %s268_s29 }
  0xa4   : > { %s2516_s13 = scalar_lea.vmem [#allocation9], %s1617_s21  ;;  %p2965_p11 = scmp.ne.s32.totalorder %s2948_s23, 0 }
  0xa6   : > { %2240 = dma.done.wait (%p2965_p11), %s269_s24, 1040  }
  0xa7   : > { %2242 = vsyncadd (%p2965_p11), %s269_s24, 4294966256  ;;  %s2522_s1 = scalar_lea.vmem [#allocation11], %s270_s18  ;;  %p2966_p3 = scmp.ne.s32.totalorder %s2325_s22, 0 }
  0xa8   : > { %v1971_v0 = vld [vmem:[#allocation6] sm:$0xff] (!%p2966_p3)   ;;  %v1972_v1 = vld [vmem:[#allocation6 + $0x8] sm:$0xff] (!%p2966_p3)   ;;  %v1973_v2 = vld [vmem:[#allocation6 + $0x10] sm:$0xff] (!%p2966_p3)  }
  0xa9   : > { %310 = sbr.rel (%p2966_p3) target bundleno = 177 (0xb1), region = 64  ;;  %439 = vst [vmem:[#allocation2] sm:$0xff] (!%p2966_p3), %v1971_v0  ;;  %440 = vst [vmem:[#allocation2 + $0x8] sm:$0xff] (!%p2966_p3), %v1972_v1  ;;  %v1974_v3 = vld [vmem:[#allocation6 + $0x18] sm:$0xff] (!%p2966_p3)   ;;  %v1975_v4 = vld [vmem:[#allocation6 + $0x20] sm:$0xff] (!%p2966_p3)  }
  0xaa   : > { %441 = vst [vmem:[#allocation2 + $0x10] sm:$0xff] (!%p2966_p3), %v1973_v2  ;;  %442 = vst [vmem:[#allocation2 + $0x18] sm:$0xff] (!%p2966_p3), %v1974_v3  ;;  %v1976_v5 = vld [vmem:[#allocation6 + $0x28] sm:$0xff] (!%p2966_p3)   ;;  %v1977_v6 = vld [vmem:[#allocation6 + $0x30] sm:$0xff] (!%p2966_p3)  }
  0xab   : > { %443 = vst [vmem:[#allocation2 + $0x20] sm:$0xff] (!%p2966_p3), %v1975_v4  ;;  %444 = vst [vmem:[#allocation2 + $0x28] sm:$0xff] (!%p2966_p3), %v1976_v5  ;;  %v1978_v7 = vld [vmem:[#allocation6 + $0x38] sm:$0xff] (!%p2966_p3)   ;;  %v1979_v8 = vld [vmem:[#allocation6 + $0x40] sm:$0xff] (!%p2966_p3)  }
  0xac   : > { %445 = vst [vmem:[#allocation2 + $0x30] sm:$0xff] (!%p2966_p3), %v1977_v6  ;;  %446 = vst [vmem:[#allocation2 + $0x38] sm:$0xff] (!%p2966_p3), %v1978_v7  ;;  %v1980_v9 = vld [vmem:[#allocation6 + $0x48] sm:$0xff] (!%p2966_p3)   ;;  %v1981_v10 = vld [vmem:[#allocation6 + $0x50] sm:$0xff] (!%p2966_p3)  }
  0xad   : > { %447 = vst [vmem:[#allocation2 + $0x40] sm:$0xff] (!%p2966_p3), %v1979_v8  ;;  %448 = vst [vmem:[#allocation2 + $0x48] sm:$0xff] (!%p2966_p3), %v1980_v9  ;;  %v1982_v11 = vld [vmem:[#allocation6 + $0x58] sm:$0xff] (!%p2966_p3)   ;;  %v1983_v12 = vld [vmem:[#allocation6 + $0x60] sm:$0xff] (!%p2966_p3)  }
  0xae   : > { %449 = vst [vmem:[#allocation2 + $0x50] sm:$0xff] (!%p2966_p3), %v1981_v10  ;;  %450 = vst [vmem:[#allocation2 + $0x58] sm:$0xff] (!%p2966_p3), %v1982_v11  ;;  %v1984_v13 = vld [vmem:[#allocation6 + $0x68] sm:$0xff] (!%p2966_p3)   ;;  %v1985_v14 = vld [vmem:[#allocation6 + $0x70] sm:$0xff] (!%p2966_p3)  }
  0xaf   : > { %451 = vst [vmem:[#allocation2 + $0x60] sm:$0xff] (!%p2966_p3), %v1983_v12  ;;  %452 = vst [vmem:[#allocation2 + $0x68] sm:$0xff] (!%p2966_p3), %v1984_v13  ;;  %v1986_v15 = vld [vmem:[#allocation6 + $0x78] sm:$0xff] (!%p2966_p3)  }
  0xb0   : > { %453 = vst [vmem:[#allocation2 + $0x70] sm:$0xff] %v1985_v14  ;;  %454 = vst [vmem:[#allocation2 + $0x78] sm:$0xff] %v1986_v15 }
  0xb1 PF: > { %v1989_v16 = vld [vmem:[%s2516_s13] sm:$0xff]   ;;  %v1990_v17 = vld [vmem:[%s2516_s13 + $0x8] sm:$0xff]   ;;  %v2272_v18 = vmov 0   ;;  %v1991_v19 = vld [vmem:[%s2516_s13 + $0x10] sm:$0xff]   ;;  %p1360_p7 = scmp.lt.s32.totalorder %s2325_s22, 1  ;;  %p1676_p1 = scmp.ne.s32.totalorder %s2325_s22, 1 }
  0xb2   : > { %1988 = vset.pattern.permute.xlu1 %v2272_v18  ;;  %1987 = vset.pattern.permute.xlu0 %v2272_v18  ;;  %v1992_v20 = vld [vmem:[%s2516_s13 + $0x18] sm:$0xff]   ;;  %v504_v21 = vld [vmem:[#allocation2] sm:$0xff]  ;;  %v472_v25 = vld [vmem:[#allocation8 + $0x88] sm:$0xff] }
  0xb3   : > { %1818 = vmatprep.subr.bf16.mxu0 %v1989_v16  ;;  %1834 = vmatprep.mubr.bf16.mxu0 %v504_v21  ;;  %v471_v22 = vld [vmem:[#allocation8 + $0x80] sm:$0xff]  ;;  %v456_v26 = vld [vmem:[#allocation8 + $0x8] sm:$0xff]  ;;  %v473_v28 = vld [vmem:[#allocation8 + $0x90] sm:$0xff]  ;;  %s1393_s23 = scalar_select %p1360_p7, 1, 0 }
  0xb4   : > { %1819 = vmatpush3.bf16.msra.mxu0 %v1989_v16  ;;  %811 = vperm.xlu0 %1987, %v471_v22   ;;  %v455_v23 = vld [vmem:[#allocation8] sm:$0xff]  ;;  %v1994_v27 = vld [vmem:[%s2516_s13 + $0x28] sm:$0xff]   ;;  %v474_v29 = vld [vmem:[#allocation8 + $0x98] sm:$0xff] }
  0xb5   : > { %1820 = vmatprep.subr.bf16.mxu0 %v1990_v17  ;;  %v1993_v24 = vld [vmem:[%s2516_s13 + $0x20] sm:$0xff]   ;;  %731 = vperm.xlu1 %1988, %v455_v23   ;;  %v1995_v30 = vld [vmem:[%s2516_s13 + $0x30] sm:$0xff]   ;;  %v458_v32 = vld [vmem:[#allocation8 + $0x18] sm:$0xff] }
  0xb6   : > { %v457_v31 = vld [vmem:[#allocation8 + $0x10] sm:$0xff]  ;;  %v1996_v33 = vld [vmem:[%s2516_s13 + $0x38] sm:$0xff]   ;;  %v475_v34 = vld [vmem:[#allocation8 + $0xa0] sm:$0xff] }
  0xb7   : > { %v476_v35 = vld [vmem:[#allocation8 + $0xa8] sm:$0xff]  ;;  %v459_v36 = vld [vmem:[#allocation8 + $0x20] sm:$0xff]  ;;  %v506_v39 = vld [vmem:[#allocation2 + $0x10] sm:$0xff] }
  0xb8   : > { %1821 = vmatpush3.bf16.msra.mxu0 %v1990_v17  ;;  %816 = vperm.xlu0 %1987, %v472_v25   ;;  %v460_v37 = vld [vmem:[#allocation8 + $0x28] sm:$0xff]  ;;  %v477_v40 = vld [vmem:[#allocation8 + $0xb0] sm:$0xff]  ;;  %v478_v41 = vld [vmem:[#allocation8 + $0xb8] sm:$0xff] }
  0xb9   : > { %1822 = vmatprep.subr.bf16.mxu0 %v1991_v19  ;;  %736 = vperm.xlu1 %1988, %v456_v26   ;;  %v505_v38 = vld [vmem:[#allocation2 + $0x8] sm:$0xff]  ;;  %v461_v42 = vld [vmem:[#allocation8 + $0x30] sm:$0xff]  ;;  %v462_v43 = vld [vmem:[#allocation8 + $0x38] sm:$0xff] }
  0xba   : > { %v507_v44 = vld [vmem:[#allocation2 + $0x18] sm:$0xff]  ;;  %v508_v45 = vld [vmem:[#allocation2 + $0x20] sm:$0xff]  ;;  %v480_v47 = vld [vmem:[#allocation8 + $0xc8] sm:$0xff] }
  0xbb   : > { %v479_v46 = vld [vmem:[#allocation8 + $0xc0] sm:$0xff]  ;;  %v464_v49 = vld [vmem:[#allocation8 + $0x48] sm:$0xff]  ;;  %v510_v51 = vld [vmem:[#allocation2 + $0x30] sm:$0xff] }
  0xbc   : > { %1823 = vmatpush3.bf16.msra.mxu0 %v1991_v19  ;;  %821 = vperm.xlu0 %1987, %v473_v28   ;;  %v463_v48 = vld [vmem:[#allocation8 + $0x40] sm:$0xff]  ;;  %v509_v50 = vld [vmem:[#allocation2 + $0x28] sm:$0xff]  ;;  %v481_v52 = vld [vmem:[#allocation8 + $0xd0] sm:$0xff] }
  0xbd   : > { %1824 = vmatprep.subr.bf16.mxu0 %v1992_v20  ;;  %826 = vperm.xlu1 %1988, %v474_v29   ;;  %v482_v53 = vld [vmem:[#allocation8 + $0xd8] sm:$0xff]  ;;  %v465_v54 = vld [vmem:[#allocation8 + $0x50] sm:$0xff]  ;;  %v512_v57 = vld [vmem:[#allocation2 + $0x40] sm:$0xff] }
  0xbe   : > { %v466_v55 = vld [vmem:[#allocation8 + $0x58] sm:$0xff]  ;;  %v483_v58 = vld [vmem:[#allocation8 + $0xe0] sm:$0xff]  ;;  %v484_v59 = vld [vmem:[#allocation8 + $0xe8] sm:$0xff] }
  0xbf   : > { %v511_v56 = vld [vmem:[#allocation2 + $0x38] sm:$0xff]  ;;  %v467_v60 = vld [vmem:[#allocation8 + $0x60] sm:$0xff]  ;;  %v468_v61 = vld [vmem:[#allocation8 + $0x68] sm:$0xff] }
  0xc0   : > { %1825 = vmatpush3.bf16.msra.mxu0 %v1992_v20  ;;  %741 = vperm.xlu0 %1987, %v457_v31   ;;  %v513_v62 = vld [vmem:[#allocation2 + $0x48] sm:$0xff]  ;;  %v514_v63 = vld [vmem:[#allocation2 + $0x50] sm:$0xff]  ;;  %v486_v1 = vld [vmem:[#allocation8 + $0xf8] sm:$0xff] }
  0xc1   : > { %1826 = vmatprep.subr.bf16.mxu0 %v1993_v24  ;;  %746 = vperm.xlu1 %1988, %v458_v32   ;;  %v485_v0 = vld [vmem:[#allocation8 + $0xf0] sm:$0xff]  ;;  %v470_v3 = vld [vmem:[#allocation8 + $0x78] sm:$0xff]  ;;  %v516_v5 = vld [vmem:[#allocation2 + $0x60] sm:$0xff] }
  0xc2   : > { %v469_v2 = vld [vmem:[#allocation8 + $0x70] sm:$0xff]  ;;  %v515_v4 = vld [vmem:[#allocation2 + $0x58] sm:$0xff]  ;;  %v517_v6 = vld [vmem:[#allocation2 + $0x68] sm:$0xff] }
  0xc3   : > { %v518_v7 = vld [vmem:[#allocation2 + $0x70] sm:$0xff]  ;;  %v519_v8 = vld [vmem:[#allocation2 + $0x78] sm:$0xff]  ;;  %v1999_v12 = vld [vmem:[#allocation3 + $0x4] ss:$8 sps:$4 sm:$0xff]  }
  0xc4   : > { %1827 = vmatpush3.bf16.msra.mxu0 %v1993_v24  ;;  %831 = vperm.xlu0 %1987, %v475_v34   ;;  %v2002_v14 = vld [vmem:[#allocation3 + $0x44] ss:$8 sps:$4 sm:$0xff]  }
  0xc5   : > { %1828 = vmatprep.subr.bf16.mxu0 %v1994_v27  ;;  %836 = vperm.xlu1 %1988, %v476_v35  }
  0xc6   : > { %1193 = vmatprep.mubr.bf16.mxu1 %v2002_v14 }
  0xc8   : > { %1829 = vmatpush3.bf16.msra.mxu0 %v1994_v27  ;;  %751 = vperm.xlu0 %1987, %v459_v36  }
  0xc9   : > { %1830 = vmatprep.subr.bf16.mxu0 %v1995_v30  ;;  %756 = vperm.xlu1 %1988, %v460_v37  }
  0xcc   : > { %1831 = vmatpush3.bf16.msra.mxu0 %v1995_v30  ;;  %841 = vperm.xlu0 %1987, %v477_v40  }
  0xcd   : > { %1832 = vmatprep.subr.bf16.mxu0 %v1996_v33  ;;  %846 = vperm.xlu1 %1988, %v478_v41  }
  0xd0   : > { %1833 = vmatpush3.bf16.msra.mxu0 %v1996_v33  ;;  %761 = vperm.xlu0 %1987, %v461_v42  }
  0xd1   : > { %766 = vperm.xlu1 %1988, %v462_v43  }
  0xd3   : > { %1835 = vmatmul.mubr.bf16.vlgmr.msra.gmra.mrb[0].mxu0 %v505_v38 }
  0xd4   : > { %1838 = vmatprep.mubr.bf16.mxu0 %v506_v39  ;;  %851 = vperm.xlu0 %1987, %v479_v46  }
  0xd5   : > { %856 = vperm.xlu1 %1988, %v480_v47  }
  0xd8   : > { %771 = vperm.xlu0 %1987, %v463_v48  }
  0xd9   : > { %776 = vperm.xlu1 %1988, %v464_v49  }
  0xdb   : > { %1839 = vmatmul.mubr.bf16.gmra.mrb[4].mxu0 %v507_v44 }
  0xdc   : > { %1842 = vmatprep.mubr.bf16.mxu0 %v508_v45  ;;  %861 = vperm.xlu0 %1987, %v481_v52  }
  0xdd   : > { %866 = vperm.xlu1 %1988, %v482_v53  }
  0xe0   : > { %781 = vperm.xlu0 %1987, %v465_v54  }
  0xe1   : > { %786 = vperm.xlu1 %1988, %v466_v55  }
  0xe3   : > { %1843 = vmatmul.mubr.bf16.gmra.mrb[8].mxu0 %v509_v50 }
  0xe4   : > { %1846 = vmatprep.mubr.bf16.mxu0 %v510_v51  ;;  %871 = vperm.xlu0 %1987, %v483_v58  }
  0xe5   : > { %876 = vperm.xlu1 %1988, %v484_v59  }
  0xe8   : > { %791 = vperm.xlu0 %1987, %v467_v60  }
  0xe9   : > { %796 = vperm.xlu1 %1988, %v468_v61  }
  0xeb   : > { %1847 = vmatmul.mubr.bf16.gmra.mrb[12].mxu0 %v511_v56 }
  0xec   : > { %1850 = vmatprep.mubr.bf16.mxu0 %v512_v57  ;;  %881 = vperm.xlu0 %1987, %v485_v0  }
  0xed   : > { %886 = vperm.xlu1 %1988, %v486_v1  }
  0xf0   : > { %801 = vperm.xlu0 %1987, %v469_v2  }
  0xf1   : > { %806 = vperm.xlu1 %1988, %v470_v3  }
  0xf3   : > { %1851 = vmatmul.mubr.bf16.gmra.mrb[16].mxu0 %v513_v62 }
  0xf4   : > { %1854 = vmatprep.mubr.bf16.mxu0 %v514_v63 }
  0xfb   : > { %1855 = vmatmul.mubr.bf16.gmra.mrb[20].mxu0 %v515_v4 }
  0xfc   : > { %1858 = vmatprep.mubr.bf16.mxu0 %v516_v5 }
 0x103   : > { %1859 = vmatmul.mubr.bf16.gmra.mrb[24].mxu0 %v517_v6 }
 0x104   : > { %1862 = vmatprep.mubr.bf16.mxu0 %v518_v7 }
 0x10b   : > { %1863 = vmatmul.mubr.bf16.gmra.mrb[28].mxu0 %v519_v8 }
 0x10c   : > { %1161 = vmatprep.mubr.bf16.mxu0 %v1999_v12 }
 0x133   : > { %v2534_v9 = vpop.permute.xlu0 %811 }
 0x134   : > { %v2536_v10 = vpop.permute.xlu1 %731 }
 0x137   : > { %v2538_v11 = vpop.permute.xlu0 %816 }
 0x138   : > { %v2540_v13 = vpop.permute.xlu1 %736 }
 0x13b   : > { %v2542_v15 = vpop.permute.xlu0 %821 }
 0x13c   : > { %v2544_v16 = vpop.permute.xlu1 %826 }
 0x13f   : > { %v2546_v17 = vpop.permute.xlu0 %741 }
 0x140   : > { %v2548_v18 = vpop.permute.xlu1 %746 }
 0x143   : > { %v2550_v19 = vpop.permute.xlu0 %831 }
 0x144   : > { %v2552_v20 = vpop.permute.xlu1 %836 }
 0x147   : > { %v2554_v21 = vpop.permute.xlu0 %751 }
 0x148   : > { %v2556_v22 = vpop.permute.xlu1 %756 }
 0x14b   : > { %v2558_v23 = vpop.permute.xlu0 %841 }
 0x14c   : > { %v2560_v24 = vpop.permute.xlu1 %846 }
 0x14f   : > { %v2562_v25 = vpop.permute.xlu0 %761 }
 0x150   : > { %v2564_v26 = vpop.permute.xlu1 %766 }
 0x153   : > { %v2566_v27 = vpop.permute.xlu0 %851 }
 0x154   : > { %v2568_v28 = vpop.permute.xlu1 %856 }
 0x157   : > { %v2570_v29 = vpop.permute.xlu0 %771 }
 0x158   : > { %v2572_v30 = vpop.permute.xlu1 %776 }
 0x15b   : > { %v2574_v31 = vpop.permute.xlu0 %861 }
 0x15c   : > { %v2576_v32 = vpop.permute.xlu1 %866 }
 0x15f   : > { %v2578_v34 = vpop.permute.xlu0 %781 }
 0x160   : > { %v2580_v36 = vpop.permute.xlu1 %786 }
 0x163   : > { %v2588_v45 = vpop.permute.xlu0 %871 }
 0x164   : > { %v2590_v46 = vpop.permute.xlu1 %876 }
 0x167   : > { %v2596_v55 = vpop.permute.xlu0 %791 }
 0x168   : > { %v2600_v57 = vpop.permute.xlu1 %796 }
 0x16b   : > { %v2602_v62 = vpop.permute.xlu0 %881 }
 0x16c   : > { %v2606_v2 = vpop.permute.xlu1 %886 }
 0x16f   : > { %v2614_v8 = vpop.permute.xlu0 %801 }
 0x170   : > { %v2616_v14 = vpop.permute.xlu1 %806 }
 0x1a6   : > { %v1836_v33 = vpop.f32.mrb[0].mxu0 }
 0x1a7   : > { %v602_v35 = vpop.f32.mrb[1].mxu0  ;;  %v891_v38 = vmul.f32 %v1836_v33, %v2546_v17 }
 0x1a8   : > { %v1837_v37 = vpop.f32.mrb[2].mxu0  ;;  %v889_v41 = vmul.f32 %v2536_v10, %v602_v35 }
 0x1a9   : > { %v892_v39 = vmul.f32 %v1837_v37, %v2548_v18  ;;  %v605_v40 = vpop.f32.mrb[3].mxu0 }
 0x1aa   : > { %v890_v42 = vmul.f32 %v2540_v13, %v605_v40 }
 0x1ab   : > { %v2586_v43 = vpack.c.bf16 %v892_v39, %v891_v38 }
 0x1ac   : > { %v921_v44 = vpack.c.bf16 %v890_v42, %v889_v41 }
 0x1ae   : > { %v1840_v47 = vpop.f32.mrb[4].mxu0 }
 0x1af   : > { %v618_v48 = vpop.f32.mrb[5].mxu0  ;;  %v895_v50 = vmul.f32 %v1840_v47, %v2562_v25 }
 0x1b0   : > { %v1841_v49 = vpop.f32.mrb[6].mxu0  ;;  %v893_v53 = vmul.f32 %v2554_v21, %v618_v48 }
 0x1b1   : > { %v896_v51 = vmul.f32 %v1841_v49, %v2564_v26  ;;  %v621_v52 = vpop.f32.mrb[7].mxu0 }
 0x1b2   : > { %v894_v54 = vmul.f32 %v2556_v22, %v621_v52 }
 0x1b3   : > { %v2598_v56 = vpack.c.bf16 %v896_v51, %v895_v50 }
 0x1b4   : > { %v923_v58 = vpack.c.bf16 %v894_v54, %v893_v53 }
 0x1b6   : > { %v1844_v59 = vpop.f32.mrb[8].mxu0 }
 0x1b7   : > { %v634_v60 = vpop.f32.mrb[9].mxu0  ;;  %v899_v63 = vmul.f32 %v1844_v59, %v2578_v34 }
 0x1b8   : > { %v1845_v61 = vpop.f32.mrb[10].mxu0  ;;  %v897_v3 = vmul.f32 %v2570_v29, %v634_v60 }
 0x1b9   : > { %v900_v0 = vmul.f32 %v1845_v61, %v2580_v36  ;;  %v637_v1 = vpop.f32.mrb[11].mxu0 }
 0x1ba   : > { %v898_v4 = vmul.f32 %v2572_v30, %v637_v1 }
 0x1bb   : > { %v2610_v5 = vpack.c.bf16 %v900_v0, %v899_v63 }
 0x1bc   : > { %v2612_v6 = vpack.c.bf16 %v898_v4, %v897_v3 }
 0x1be   : > { %v1848_v7 = vpop.f32.mrb[12].mxu0 }
 0x1bf   : > { %v650_v12 = vpop.f32.mrb[13].mxu0  ;;  %v903_v35 = vmul.f32 %v1848_v7, %v2614_v8 }
 0x1c0   : > { %v1849_v33 = vpop.f32.mrb[14].mxu0  ;;  %v901_v39 = vmul.f32 %v2596_v55, %v650_v12 }
 0x1c1   : > { %v904_v37 = vmul.f32 %v1849_v33, %v2616_v14  ;;  %v653_v38 = vpop.f32.mrb[15].mxu0 }
 0x1c2   : > { %v902_v40 = vmul.f32 %v2600_v57, %v653_v38 }
 0x1c3   : > { %v2622_v41 = vpack.c.bf16 %v904_v37, %v903_v35 }
 0x1c4   : > { %v2624_v42 = vpack.c.bf16 %v902_v40, %v901_v39 }
 0x1c6   : > { %v1852_v47 = vpop.f32.mrb[16].mxu0 }
 0x1c7   : > { %v666_v48 = vpop.f32.mrb[17].mxu0  ;;  %v907_v50 = vmul.f32 %v1852_v47, %v2542_v15 }
 0x1c8   : > { %v1853_v49 = vpop.f32.mrb[18].mxu0  ;;  %v905_v53 = vmul.f32 %v2534_v9, %v666_v48 }
 0x1c9   : > { %v908_v51 = vmul.f32 %v1853_v49, %v2544_v16  ;;  %v669_v52 = vpop.f32.mrb[19].mxu0 }
 0x1ca   : > { %v906_v54 = vmul.f32 %v2538_v11, %v669_v52 }
 0x1cb   : > { %v930_v59 = vpack.c.bf16 %v908_v51, %v907_v50 }
 0x1cc   : > { %v929_v60 = vpack.c.bf16 %v906_v54, %v905_v53 }
 0x1ce   : > { %v1856_v61 = vpop.f32.mrb[20].mxu0  ;;  %1706 = vmatprep.subr.bf16.mxu0 %v929_v60  ;;  %1866 = vmatprep.subr.bf16.mxu1 %v929_v60 }
 0x1cf   : > { %v682_v63 = vpop.f32.mrb[21].mxu0  ;;  %1707 = vmatpush3.bf16.msra.mxu0 %v921_v44  ;;  %1874 = vmatpush3.bf16.msra.mxu1 %v921_v44  ;;  %v911_v1 = vmul.f32 %v1856_v61, %v2558_v23 }
 0x1d0   : > { %v1857_v0 = vpop.f32.mrb[22].mxu0  ;;  %1708 = vmatprep.subr.bf16.mxu0 %v930_v59  ;;  %1867 = vmatprep.subr.bf16.mxu1 %v930_v59  ;;  %v909_v7 = vmul.f32 %v2550_v19, %v682_v63 }
 0x1d1   : > { %v912_v3 = vmul.f32 %v1857_v0, %v2560_v24  ;;  %v685_v4 = vpop.f32.mrb[23].mxu0  ;;  %v2000_v0 = vld [vmem:[#allocation3 + $0x40] ss:$8 sps:$4 sm:$0xff]  }
 0x1d2   : > { %v910_v12 = vmul.f32 %v2552_v20, %v685_v4  ;;  %v2008_v4 = vld [vmem:[#allocation3 + $0x50] ss:$8 sps:$4 sm:$0xff]  }
 0x1d3   : > { %v932_v33 = vpack.c.bf16 %v912_v3, %v911_v1  ;;  %1709 = vmatpush3.bf16.msra.mxu0 %v2586_v43  ;;  %1875 = vmatpush3.bf16.msra.mxu1 %v2586_v43  ;;  %v2003_v1 = vld [vmem:[#allocation3 + $0x14] ss:$8 sps:$4 sm:$0xff]  }
 0x1d4   : > { %v931_v35 = vpack.c.bf16 %v910_v12, %v909_v7  ;;  %v2005_v3 = vld [vmem:[#allocation3 + $0x54] ss:$8 sps:$4 sm:$0xff]   ;;  %v2009_v7 = vld [vmem:[#allocation3 + $0x24] ss:$8 sps:$4 sm:$0xff]  }
 0x1d5   : > { %v2011_v12 = vld [vmem:[#allocation3 + $0x64] ss:$8 sps:$4 sm:$0xff]  }
 0x1d6   : > { %v1860_v37 = vpop.f32.mrb[24].mxu0  ;;  %1710 = vmatprep.subr.bf16.mxu0 %v931_v35  ;;  %1868 = vmatprep.subr.bf16.mxu1 %v931_v35  ;;  %v2015_v35 = vld [vmem:[#allocation3 + $0x34] ss:$8 sps:$4 sm:$0xff]  }
 0x1d7   : > { %v698_v44 = vpop.f32.mrb[25].mxu0  ;;  %1711 = vmatpush3.bf16.msra.mxu0 %v923_v58  ;;  %1876 = vmatpush3.bf16.msra.mxu1 %v923_v58  ;;  %v915_v39 = vmul.f32 %v1860_v37, %v2574_v31  ;;  %v2017_v37 = vld [vmem:[#allocation3 + $0x74] ss:$8 sps:$4 sm:$0xff]  }
 0x1d8   : > { %v1861_v38 = vpop.f32.mrb[26].mxu0  ;;  %1712 = vmatprep.subr.bf16.mxu0 %v932_v33  ;;  %1869 = vmatprep.subr.bf16.mxu1 %v932_v33  ;;  %v913_v48 = vmul.f32 %v2566_v27, %v698_v44  ;;  %v2014_v33 = vld [vmem:[#allocation3 + $0x60] ss:$8 sps:$4 sm:$0xff]   ;;  %v2020_v44 = vld [vmem:[#allocation3 + $0x70] ss:$8 sps:$4 sm:$0xff]  }
 0x1d9   : > { %v916_v40 = vmul.f32 %v1861_v38, %v2576_v32  ;;  %v701_v47 = vpop.f32.mrb[27].mxu0  ;;  %v2021_v38 = vld [vmem:[#allocation3 + $0x84] ss:$8 sps:$4 sm:$0xff]  }
 0x1da   : > { %v914_v49 = vmul.f32 %v2568_v28, %v701_v47  ;;  %v2026_v47 = vld [vmem:[#allocation3 + $0x90] ss:$8 sps:$4 sm:$0xff]  }
 0x1db   : > { %v934_v43 = vpack.c.bf16 %v916_v40, %v915_v39  ;;  %1713 = vmatpush3.bf16.msra.mxu0 %v2598_v56  ;;  %1877 = vmatpush3.bf16.msra.mxu1 %v2598_v56  ;;  %v2023_v39 = vld [vmem:[#allocation3 + $0x80] ss:$8 sps:$4 sm:$0xff]   ;;  %v2024_v40 = vld [vmem:[#allocation3 + $0x94] ss:$8 sps:$4 sm:$0xff]  }
 0x1dc   : > { %v933_v50 = vpack.c.bf16 %v914_v49, %v913_v48  ;;  %v2027_v48 = vld [vmem:[#allocation3 + $0xa4] ss:$8 sps:$4 sm:$0xff]   ;;  %v2029_v49 = vld [vmem:[#allocation3 + $0xa0] ss:$8 sps:$4 sm:$0xff]  }
 0x1de   : > { %v1864_v51 = vpop.f32.mrb[28].mxu0  ;;  %1714 = vmatprep.subr.bf16.mxu0 %v933_v50  ;;  %1870 = vmatprep.subr.bf16.mxu1 %v933_v50  ;;  %v2032_v50 = vld [vmem:[#allocation3 + $0xb0] ss:$8 sps:$4 sm:$0xff]  }
 0x1df   : > { %v714_v58 = vpop.f32.mrb[29].mxu0  ;;  %1715 = vmatpush3.bf16.msra.mxu0 %v2612_v6  ;;  %1878 = vmatpush3.bf16.msra.mxu1 %v2612_v6  ;;  %v919_v53 = vmul.f32 %v1864_v51, %v2602_v62  ;;  %v1997_v6 = vld [vmem:[#allocation3] ss:$8 sps:$4 sm:$0xff]   ;;  %v2033_v51 = vld [vmem:[#allocation3 + $0xc4] ss:$8 sps:$4 sm:$0xff]  }
 0x1e0   : > { %v1865_v52 = vpop.f32.mrb[30].mxu0  ;;  %1716 = vmatprep.subr.bf16.mxu0 %v934_v43  ;;  %1871 = vmatprep.subr.bf16.mxu1 %v934_v43  ;;  %v917_v60 = vmul.f32 %v2588_v45, %v714_v58  ;;  %v2030_v43 = vld [vmem:[#allocation3 + $0xb4] ss:$8 sps:$4 sm:$0xff]   ;;  %v2035_v58 = vld [vmem:[#allocation3 + $0xc0] ss:$8 sps:$4 sm:$0xff]  }
 0x1e1   : > { %v920_v54 = vmul.f32 %v1865_v52, %v2606_v2  ;;  %v717_v59 = vpop.f32.mrb[31].mxu0  ;;  %v2036_v52 = vld [vmem:[#allocation3 + $0xd4] ss:$8 sps:$4 sm:$0xff]  }
 0x1e2   : > { %v918_v56 = vmul.f32 %v2590_v46, %v717_v59  ;;  %v2041_v59 = vld [vmem:[#allocation3 + $0xe0] ss:$8 sps:$4 sm:$0xff]  }
 0x1e3   : > { %v936_v61 = vpack.c.bf16 %v920_v54, %v919_v53  ;;  %1717 = vmatpush3.bf16.msra.mxu0 %v2610_v5  ;;  %1879 = vmatpush3.bf16.msra.mxu1 %v2610_v5  ;;  %v2007_v5 = vld [vmem:[#allocation3 + $0x10] ss:$8 sps:$4 sm:$0xff]   ;;  %v2039_v54 = vld [vmem:[#allocation3 + $0xe4] ss:$8 sps:$4 sm:$0xff]  }
 0x1e4   : > { %v935_v63 = vpack.c.bf16 %v918_v56, %v917_v60  ;;  %v2038_v53 = vld [vmem:[#allocation3 + $0xd0] ss:$8 sps:$4 sm:$0xff]   ;;  %v2042_v60 = vld [vmem:[#allocation3 + $0xf4] ss:$8 sps:$4 sm:$0xff]  }
 0x1e5   : > { %v2044_v56 = vld [vmem:[#allocation3 + $0xf0] ss:$8 sps:$4 sm:$0xff]  }
 0x1e6   : > { %1718 = vmatprep.subr.bf16.mxu0 %v935_v63  ;;  %1872 = vmatprep.subr.bf16.mxu1 %v935_v63 }
 0x1e7   : > { %1719 = vmatpush3.bf16.msra.mxu0 %v2624_v42  ;;  %1880 = vmatpush3.bf16.msra.mxu1 %v2624_v42  ;;  %v2013_v42 = vld [vmem:[#allocation3 + $0x20] ss:$8 sps:$4 sm:$0xff]  }
 0x1e8   : > { %1720 = vmatprep.subr.bf16.mxu0 %v936_v61  ;;  %1873 = vmatprep.subr.bf16.mxu1 %v936_v61 }
 0x1eb   : > { %1721 = vmatpush3.bf16.msra.mxu0 %v2622_v41  ;;  %1881 = vmatpush3.bf16.msra.mxu1 %v2622_v41  ;;  %v2019_v41 = vld [vmem:[#allocation3 + $0x30] ss:$8 sps:$4 sm:$0xff]  }
 0x1ee   : > { %1162 = vmatmul.mubr.bf16.vlgmr.msra.gmra.mrb[32].mxu0 %v1997_v6  ;;  %1194 = vmatmul.mubr.bf16.vlgmr.msra.gmra.mrb[0].mxu1 %v2000_v0 }
 0x1ef   : > { %1169 = vmatprep.mubr.bf16.mxu0 %v2003_v1  ;;  %1201 = vmatprep.mubr.bf16.mxu1 %v2005_v3 }
 0x1f6   : > { %1170 = vmatmul.mubr.bf16.gmra.mrb[36].mxu0 %v2007_v5  ;;  %1202 = vmatmul.mubr.bf16.gmra.mrb[4].mxu1 %v2008_v4 }
 0x1f7   : > { %1177 = vmatprep.mubr.bf16.mxu0 %v2009_v7  ;;  %1209 = vmatprep.mubr.bf16.mxu1 %v2011_v12  ;;  %v2656_v7 = vld [vmem:[%s2522_s1] ss:$0 sm:$0xff]  ;;  %v1394_v12 = vstv %s1393_s23 }
 0x1f8   : > { %vm2664_vm0 = vcmp.eq.s32.totalorder %v1394_v12, 1 }
 0x1fe   : > { %1178 = vmatmul.mubr.bf16.gmra.mrb[40].mxu0 %v2013_v42  ;;  %1210 = vmatmul.mubr.bf16.gmra.mrb[8].mxu1 %v2014_v33 }
 0x1ff   : > { %1185 = vmatprep.mubr.bf16.mxu0 %v2015_v35  ;;  %1217 = vmatprep.mubr.bf16.mxu1 %v2017_v37 }
 0x206   : > { %1186 = vmatmul.mubr.bf16.gmra.mrb[44].mxu0 %v2019_v41  ;;  %1218 = vmatmul.mubr.bf16.gmra.mrb[12].mxu1 %v2020_v44 }
 0x207   : > { %1225 = vmatprep.mubr.bf16.mxu1 %v2021_v38 }
 0x20e   : > { %1226 = vmatmul.mubr.bf16.gmra.mrb[16].mxu1 %v2023_v39 }
 0x20f   : > { %1233 = vmatprep.mubr.bf16.mxu1 %v2024_v40 }
 0x216   : > { %1234 = vmatmul.mubr.bf16.gmra.mrb[20].mxu1 %v2026_v47 }
 0x217   : > { %1241 = vmatprep.mubr.bf16.mxu1 %v2027_v48 }
 0x21e   : > { %1242 = vmatmul.mubr.bf16.gmra.mrb[24].mxu1 %v2029_v49 }
 0x21f   : > { %1249 = vmatprep.mubr.bf16.mxu1 %v2030_v43 }
 0x226   : > { %1250 = vmatmul.mubr.bf16.gmra.mrb[28].mxu1 %v2032_v50 }
 0x227   : > { %1257 = vmatprep.mubr.bf16.mxu1 %v2033_v51 }
 0x22e   : > { %1258 = vmatmul.mubr.bf16.gmra.mrb[32].mxu1 %v2035_v58 }
 0x22f   : > { %1265 = vmatprep.mubr.bf16.mxu1 %v2036_v52 }
 0x236   : > { %1266 = vmatmul.mubr.bf16.gmra.mrb[36].mxu1 %v2038_v53 }
 0x237   : > { %1273 = vmatprep.mubr.bf16.mxu1 %v2039_v54 }
 0x23e   : > { %1274 = vmatmul.mubr.bf16.gmra.mrb[40].mxu1 %v2041_v59 }
 0x23f   : > { %1281 = vmatprep.mubr.bf16.mxu1 %v2042_v60 }
 0x246   : > { %1282 = vmatmul.mubr.bf16.gmra.mrb[44].mxu1 %v2044_v56 }
 0x2c1   : > { %v1722_v61 = vpop.f32.mrb[32].mxu0  ;;  %v1746_v63 = vpop.f32.mrb[0].mxu1 }
 0x2c2   : > { %v1723_v6 = vpop.f32.mrb[33].mxu0  ;;  %v1747_v0 = vpop.f32.mrb[1].mxu1 }
 0x2c3   : > { %v1724_v1 = vadd.f32 %v1723_v6, %v1722_v61  ;;  %v1748_v3 = vadd.f32 %v1747_v0, %v1746_v63  ;;  %v1725_v5 = vpop.f32.mrb[34].mxu0  ;;  %v1749_v4 = vpop.f32.mrb[2].mxu1 }
 0x2c4   : > { %v1726_v42 = vpop.f32.mrb[35].mxu0  ;;  %v1750_v33 = vpop.f32.mrb[3].mxu1 }
 0x2c5   : > { %v1290_v35 = vmul.f32 %v1724_v1, %v2536_v10  ;;  %v1298_v37 = vmul.f32 %v1748_v3, %v2570_v29  ;;  %v1727_v41 = vadd.f32 %v1726_v42, %v1725_v5  ;;  %v1751_v44 = vadd.f32 %v1750_v33, %v1749_v4 }
 0x2c7   : > { %v1328_v38 = vadd.f32 %v2656_v7, %v1290_v35  ;;  %v1336_v39 = vadd.f32 %v2656_v7, %v1298_v37  ;;  %v1291_v40 = vmul.f32 %v1727_v41, %v2540_v13  ;;  %v1299_v47 = vmul.f32 %v1751_v44, %v2572_v30 }
 0x2c9   : > { %v1361_v49 = vmax.f32 %v1328_v38, 0.0  ;;  %v1369_v43 = vmax.f32 %v1336_v39, 0.0  ;;  %v1329_v10 = vadd.f32 %v2656_v7, %v1291_v40  ;;  %v1337_v29 = vadd.f32 %v2656_v7, %v1299_v47  ;;  %v1728_v50 = vpop.f32.mrb[36].mxu0  ;;  %v1752_v51 = vpop.f32.mrb[4].mxu1 }
 0x2ca   : > { %v1729_v58 = vpop.f32.mrb[37].mxu0  ;;  %v1753_v52 = vpop.f32.mrb[5].mxu1 }
 0x2cb   : > { %v1362_v53 = vmax.f32 %v1329_v10, 0.0  ;;  %v1370_v54 = vmax.f32 %v1337_v29, 0.0  ;;  %v1731_v59 = vpop.f32.mrb[38].mxu0  ;;  %v1755_v13 = vpop.f32.mrb[6].mxu1  ;;  %v2672_v30 = vsel %vm2664_vm0, %v1361_v49, %v1328_v38  ;;  %v2676_v60 = vsel %vm2664_vm0, %v1369_v43, %v1336_v39 }
 0x2cc   : > { %v1730_v56 = vadd.f32 %v1729_v58, %v1728_v50  ;;  %v1754_v61 = vadd.f32 %v1753_v52, %v1752_v51  ;;  %v1732_v63 = vpop.f32.mrb[39].mxu0  ;;  %v1756_v6 = vpop.f32.mrb[7].mxu1  ;;  %1464 = vst [vmem:[#allocation12] sm:$0xff] (!%p1676_p1), %v2672_v30  ;;  %1472 = vst [vmem:[#allocation12 + $0x40] sm:$0xff] (!%p1676_p1), %v2676_v60 }
 0x2cd   : > { %v2680_v0 = vsel %vm2664_vm0, %v1362_v53, %v1329_v10  ;;  %v2684_v1 = vsel %vm2664_vm0, %v1370_v54, %v1337_v29  ;;  %v1733_v3 = vadd.f32 %v1732_v63, %v1731_v59  ;;  %v1757_v5 = vadd.f32 %v1756_v6, %v1755_v13 }
 0x2ce   : > { %v1428_v4 = vpack.c.bf16 %v2680_v0, %v2672_v30  ;;  %v1432_v12 = vpack.c.bf16 %v2684_v1, %v2676_v60  ;;  %v1292_v42 = vmul.f32 %v1730_v56, %v2546_v17  ;;  %v1300_v33 = vmul.f32 %v1754_v61, %v2578_v34  ;;  %1465 = vst [vmem:[#allocation12 + $0x8] sm:$0xff] (!%p1676_p1), %v2680_v0 }
 0x2cf   : > { %v1293_v35 = vmul.f32 %v1733_v3, %v2548_v18  ;;  %v1301_v37 = vmul.f32 %v1757_v5, %v2580_v36  ;;  %1473 = vst [vmem:[#allocation12 + $0x48] sm:$0xff] (!%p1676_p1), %v2684_v1 }
 0x2d0   : > { %1444 = vst [vmem:[#allocation2] sm:$0xff] %v1428_v4  ;;  %1448 = vst [vmem:[#allocation2 + $0x20] sm:$0xff] %v1432_v12  ;;  %v1330_v41 = vadd.f32 %v2656_v7, %v1292_v42  ;;  %v1338_v44 = vadd.f32 %v2656_v7, %v1300_v33 }
 0x2d1   : > { %v1331_v38 = vadd.f32 %v2656_v7, %v1293_v35  ;;  %v1339_v39 = vadd.f32 %v2656_v7, %v1301_v37  ;;  %v1734_v40 = vpop.f32.mrb[40].mxu0  ;;  %v1758_v47 = vpop.f32.mrb[8].mxu1 }
 0x2d2   : > { %v1363_v49 = vmax.f32 %v1330_v41, 0.0  ;;  %v1371_v17 = vmax.f32 %v1338_v44, 0.0  ;;  %v1735_v43 = vpop.f32.mrb[41].mxu0  ;;  %v1759_v34 = vpop.f32.mrb[9].mxu1 }
 0x2d3   : > { %v1364_v10 = vmax.f32 %v1331_v38, 0.0  ;;  %v1372_v18 = vmax.f32 %v1339_v39, 0.0  ;;  %v1736_v29 = vadd.f32 %v1735_v43, %v1734_v40  ;;  %v1760_v36 = vadd.f32 %v1759_v34, %v1758_v47  ;;  %v1737_v50 = vpop.f32.mrb[42].mxu0  ;;  %v1761_v51 = vpop.f32.mrb[10].mxu1 }
 0x2d4   : > { %v2700_v58 = vsel %vm2664_vm0, %v1363_v49, %v1330_v41  ;;  %v2704_v52 = vsel %vm2664_vm0, %v1371_v17, %v1338_v44  ;;  %v1738_v53 = vpop.f32.mrb[43].mxu0  ;;  %v1762_v54 = vpop.f32.mrb[11].mxu1 }
 0x2d5   : > { %v2708_v59 = vsel %vm2664_vm0, %v1364_v10, %v1331_v38  ;;  %v2712_v13 = vsel %vm2664_vm0, %v1372_v18, %v1339_v39  ;;  %v1294_v56 = vmul.f32 %v1736_v29, %v2554_v21  ;;  %v1302_v61 = vmul.f32 %v1760_v36, %v2596_v55  ;;  %1466 = vst [vmem:[#allocation12 + $0x10] sm:$0xff] (!%p1676_p1), %v2700_v58 }
 0x2d6   : > { %v1429_v63 = vpack.c.bf16 %v2708_v59, %v2700_v58  ;;  %v1433_v6 = vpack.c.bf16 %v2712_v13, %v2704_v52  ;;  %v1739_v3 = vadd.f32 %v1738_v53, %v1737_v50  ;;  %v1763_v5 = vadd.f32 %v1762_v54, %v1761_v51  ;;  %1467 = vst [vmem:[#allocation12 + $0x18] sm:$0xff] (!%p1676_p1), %v2708_v59 }
 0x2d7   : > { %v1332_v4 = vadd.f32 %v2656_v7, %v1294_v56  ;;  %v1340_v12 = vadd.f32 %v2656_v7, %v1302_v61  ;;  %1474 = vst [vmem:[#allocation12 + $0x50] sm:$0xff] (!%p1676_p1), %v2704_v52  ;;  %1475 = vst [vmem:[#allocation12 + $0x58] sm:$0xff] (!%p1676_p1), %v2712_v13 }
 0x2d8   : > { %1445 = vst [vmem:[#allocation2 + $0x8] sm:$0xff] %v1429_v63  ;;  %1449 = vst [vmem:[#allocation2 + $0x28] sm:$0xff] %v1433_v6  ;;  %v1295_v42 = vmul.f32 %v1739_v3, %v2556_v22  ;;  %v1303_v21 = vmul.f32 %v1763_v5, %v2600_v57 }
 0x2d9   : > { %v1740_v33 = vpop.f32.mrb[44].mxu0  ;;  %v1764_v55 = vpop.f32.mrb[12].mxu1  ;;  %v1365_v35 = vmax.f32 %v1332_v4, 0.0  ;;  %v1373_v37 = vmax.f32 %v1340_v12, 0.0 }
 0x2da   : > { %v1333_v41 = vadd.f32 %v2656_v7, %v1295_v42  ;;  %v1341_v44 = vadd.f32 %v2656_v7, %v1303_v21  ;;  %v1741_v38 = vpop.f32.mrb[45].mxu0  ;;  %v1765_v39 = vpop.f32.mrb[13].mxu1 }
 0x2db   : > { %v1742_v40 = vadd.f32 %v1741_v38, %v1740_v33  ;;  %v1766_v47 = vadd.f32 %v1765_v39, %v1764_v55  ;;  %v1743_v49 = vpop.f32.mrb[46].mxu0  ;;  %v1767_v17 = vpop.f32.mrb[14].mxu1  ;;  %v2730_v50 = vsel %vm2664_vm0, %v1365_v35, %v1332_v4  ;;  %v2734_v51 = vsel %vm2664_vm0, %v1373_v37, %v1340_v12 }
 0x2dc   : > { %v1366_v43 = vmax.f32 %v1333_v41, 0.0  ;;  %v1374_v34 = vmax.f32 %v1341_v44, 0.0  ;;  %v1744_v10 = vpop.f32.mrb[47].mxu0  ;;  %v1768_v22 = vpop.f32.mrb[15].mxu1  ;;  %1468 = vst [vmem:[#allocation12 + $0x20] sm:$0xff] (!%p1676_p1), %v2730_v50  ;;  %1476 = vst [vmem:[#allocation12 + $0x60] sm:$0xff] (!%p1676_p1), %v2734_v51 }
 0x2dd   : > { %v1296_v57 = vmul.f32 %v1742_v40, %v2562_v25  ;;  %v1304_v18 = vmul.f32 %v1766_v47, %v2614_v8  ;;  %v1745_v29 = vadd.f32 %v1744_v10, %v1743_v49  ;;  %v1769_v36 = vadd.f32 %v1768_v22, %v1767_v17 }
 0x2de   : > { %v2738_v53 = vsel %vm2664_vm0, %v1366_v43, %v1333_v41  ;;  %v2742_v54 = vsel %vm2664_vm0, %v1374_v34, %v1341_v44 }
 0x2df   : > { %v1430_v25 = vpack.c.bf16 %v2738_v53, %v2730_v50  ;;  %v1434_v8 = vpack.c.bf16 %v2742_v54, %v2734_v51  ;;  %v1334_v56 = vadd.f32 %v2656_v7, %v1296_v57  ;;  %v1342_v61 = vadd.f32 %v2656_v7, %v1304_v18  ;;  %1469 = vst [vmem:[#allocation12 + $0x28] sm:$0xff] (!%p1676_p1), %v2738_v53 }
 0x2e0   : > { %v1297_v63 = vmul.f32 %v1745_v29, %v2564_v26  ;;  %v1305_v6 = vmul.f32 %v1769_v36, %v2616_v14  ;;  %1477 = vst [vmem:[#allocation12 + $0x68] sm:$0xff] (!%p1676_p1), %v2742_v54 }
 0x2e1   : > { %1446 = vst [vmem:[#allocation2 + $0x10] sm:$0xff] %v1430_v25  ;;  %1450 = vst [vmem:[#allocation2 + $0x30] sm:$0xff] %v1434_v8  ;;  %v1770_v3 = vpop.f32.mrb[16].mxu1  ;;  %v1367_v5 = vmax.f32 %v1334_v56, 0.0  ;;  %v1375_v4 = vmax.f32 %v1342_v61, 0.0 }
 0x2e2   : > { %v1335_v12 = vadd.f32 %v2656_v7, %v1297_v63  ;;  %v1343_v42 = vadd.f32 %v2656_v7, %v1305_v6  ;;  %v1771_v21 = vpop.f32.mrb[17].mxu1 }
 0x2e3   : > { %v1772_v33 = vadd.f32 %v1771_v21, %v1770_v3  ;;  %v1773_v55 = vpop.f32.mrb[18].mxu1  ;;  %v2757_v14 = vsel %vm2664_vm0, %v1367_v5, %v1334_v56  ;;  %v2761_v38 = vsel %vm2664_vm0, %v1375_v4, %v1342_v61 }
 0x2e4   : > { %v1368_v35 = vmax.f32 %v1335_v12, 0.0  ;;  %v1376_v37 = vmax.f32 %v1343_v42, 0.0  ;;  %v1774_v41 = vpop.f32.mrb[19].mxu1  ;;  %1470 = vst [vmem:[#allocation12 + $0x30] sm:$0xff] (!%p1676_p1), %v2757_v14  ;;  %1478 = vst [vmem:[#allocation12 + $0x70] sm:$0xff] (!%p1676_p1), %v2761_v38 }
 0x2e5   : > { %v1306_v44 = vmul.f32 %v1772_v33, %v2534_v9  ;;  %v1775_v26 = vadd.f32 %v1774_v41, %v1773_v55 }
 0x2e6   : > { %v2765_v39 = vsel %vm2664_vm0, %v1368_v35, %v1335_v12  ;;  %v2769_v40 = vsel %vm2664_vm0, %v1376_v37, %v1343_v42 }
 0x2e7   : > { %v1431_v9 = vpack.c.bf16 %v2765_v39, %v2757_v14  ;;  %v1435_v47 = vpack.c.bf16 %v2769_v40, %v2761_v38  ;;  %v1344_v49 = vadd.f32 %v2656_v7, %v1306_v44  ;;  %v1307_v17 = vmul.f32 %v1775_v26, %v2538_v11  ;;  %1471 = vst [vmem:[#allocation12 + $0x38] sm:$0xff] (!%p1676_p1), %v2765_v39 }
 0x2e8   : > { %1479 = vst [vmem:[#allocation12 + $0x78] sm:$0xff] (!%p1676_p1), %v2769_v40 }
 0x2e9   : > { %1447 = vst [vmem:[#allocation2 + $0x18] sm:$0xff] %v1431_v9  ;;  %1451 = vst [vmem:[#allocation2 + $0x38] sm:$0xff] %v1435_v47  ;;  %v1377_v43 = vmax.f32 %v1344_v49, 0.0  ;;  %v1345_v34 = vadd.f32 %v2656_v7, %v1307_v17  ;;  %v1776_v10 = vpop.f32.mrb[20].mxu1 }
 0x2ea   : > { %v1777_v22 = vpop.f32.mrb[21].mxu1 }
 0x2eb   : > { %v1378_v57 = vmax.f32 %v1345_v34, 0.0  ;;  %v1778_v18 = vadd.f32 %v1777_v22, %v1776_v10  ;;  %v1779_v29 = vpop.f32.mrb[22].mxu1  ;;  %v2780_v25 = vsel %vm2664_vm0, %v1377_v43, %v1344_v49 }
 0x2ec   : > { %v1780_v36 = vpop.f32.mrb[23].mxu1  ;;  %1480 = vst [vmem:[#allocation12 + $0x80] sm:$0xff] (!%p1676_p1), %v2780_v25 }
 0x2ed   : > { %v2784_v8 = vsel %vm2664_vm0, %v1378_v57, %v1345_v34  ;;  %v1308_v11 = vmul.f32 %v1778_v18, %v2542_v15  ;;  %v1781_v56 = vadd.f32 %v1780_v36, %v1779_v29 }
 0x2ee   : > { %v1436_v61 = vpack.c.bf16 %v2784_v8, %v2780_v25  ;;  %1481 = vst [vmem:[#allocation12 + $0x88] sm:$0xff] (!%p1676_p1), %v2784_v8 }
 0x2ef   : > { %v1346_v63 = vadd.f32 %v2656_v7, %v1308_v11  ;;  %v1309_v6 = vmul.f32 %v1781_v56, %v2544_v16 }
 0x2f0   : > { %1452 = vst [vmem:[#allocation2 + $0x40] sm:$0xff] %v1436_v61 }
 0x2f1   : > { %v1379_v3 = vmax.f32 %v1346_v63, 0.0  ;;  %v1347_v5 = vadd.f32 %v2656_v7, %v1309_v6  ;;  %v1782_v4 = vpop.f32.mrb[24].mxu1 }
 0x2f2   : > { %v1783_v12 = vpop.f32.mrb[25].mxu1 }
 0x2f3   : > { %v1380_v42 = vmax.f32 %v1347_v5, 0.0  ;;  %v1784_v21 = vadd.f32 %v1783_v12, %v1782_v4  ;;  %v1785_v33 = vpop.f32.mrb[26].mxu1  ;;  %v2794_v15 = vsel %vm2664_vm0, %v1379_v3, %v1346_v63 }
 0x2f4   : > { %v1786_v55 = vpop.f32.mrb[27].mxu1  ;;  %1482 = vst [vmem:[#allocation12 + $0x90] sm:$0xff] (!%p1676_p1), %v2794_v15 }
 0x2f5   : > { %v2798_v35 = vsel %vm2664_vm0, %v1380_v42, %v1347_v5  ;;  %v1310_v16 = vmul.f32 %v1784_v21, %v2550_v19  ;;  %v1787_v37 = vadd.f32 %v1786_v55, %v1785_v33 }
 0x2f6   : > { %v1437_v41 = vpack.c.bf16 %v2798_v35, %v2794_v15  ;;  %1483 = vst [vmem:[#allocation12 + $0x98] sm:$0xff] (!%p1676_p1), %v2798_v35 }
 0x2f7   : > { %v1348_v44 = vadd.f32 %v2656_v7, %v1310_v16  ;;  %v1311_v26 = vmul.f32 %v1787_v37, %v2552_v20 }
 0x2f8   : > { %1453 = vst [vmem:[#allocation2 + $0x48] sm:$0xff] %v1437_v41 }
 0x2f9   : > { %v1381_v9 = vmax.f32 %v1348_v44, 0.0  ;;  %v1349_v47 = vadd.f32 %v2656_v7, %v1311_v26  ;;  %v1788_v49 = vpop.f32.mrb[28].mxu1 }
 0x2fa   : > { %v1789_v17 = vpop.f32.mrb[29].mxu1 }
 0x2fb   : > { %v1382_v43 = vmax.f32 %v1349_v47, 0.0  ;;  %v1790_v34 = vadd.f32 %v1789_v17, %v1788_v49  ;;  %v1791_v10 = vpop.f32.mrb[30].mxu1  ;;  %v2808_v19 = vsel %vm2664_vm0, %v1381_v9, %v1348_v44 }
 0x2fc   : > { %v1792_v22 = vpop.f32.mrb[31].mxu1  ;;  %1484 = vst [vmem:[#allocation12 + $0xa0] sm:$0xff] (!%p1676_p1), %v2808_v19 }
 0x2fd   : > { %v2812_v57 = vsel %vm2664_vm0, %v1382_v43, %v1349_v47  ;;  %v1312_v20 = vmul.f32 %v1790_v34, %v2558_v23  ;;  %v1793_v18 = vadd.f32 %v1792_v22, %v1791_v10 }
 0x2fe   : > { %v1438_v29 = vpack.c.bf16 %v2812_v57, %v2808_v19  ;;  %1485 = vst [vmem:[#allocation12 + $0xa8] sm:$0xff] (!%p1676_p1), %v2812_v57 }
 0x2ff   : > { %v1350_v36 = vadd.f32 %v2656_v7, %v1312_v20  ;;  %v1313_v11 = vmul.f32 %v1793_v18, %v2560_v24 }
 0x300   : > { %1454 = vst [vmem:[#allocation2 + $0x50] sm:$0xff] %v1438_v29 }
 0x301   : > { %v1383_v56 = vmax.f32 %v1350_v36, 0.0  ;;  %v1351_v61 = vadd.f32 %v2656_v7, %v1313_v11  ;;  %v1794_v63 = vpop.f32.mrb[32].mxu1 }
 0x302   : > { %v1795_v6 = vpop.f32.mrb[33].mxu1 }
 0x303   : > { %v1384_v3 = vmax.f32 %v1351_v61, 0.0  ;;  %v1796_v5 = vadd.f32 %v1795_v6, %v1794_v63  ;;  %v1797_v4 = vpop.f32.mrb[34].mxu1  ;;  %v2822_v23 = vsel %vm2664_vm0, %v1383_v56, %v1350_v36 }
 0x304   : > { %v1798_v12 = vpop.f32.mrb[35].mxu1  ;;  %1486 = vst [vmem:[#allocation12 + $0xb0] sm:$0xff] (!%p1676_p1), %v2822_v23 }
 0x305   : > { %v2826_v42 = vsel %vm2664_vm0, %v1384_v3, %v1351_v61  ;;  %v1314_v24 = vmul.f32 %v1796_v5, %v2566_v27  ;;  %v1799_v21 = vadd.f32 %v1798_v12, %v1797_v4 }
 0x306   : > { %v1439_v33 = vpack.c.bf16 %v2826_v42, %v2822_v23  ;;  %1487 = vst [vmem:[#allocation12 + $0xb8] sm:$0xff] (!%p1676_p1), %v2826_v42 }
 0x307   : > { %v1352_v55 = vadd.f32 %v2656_v7, %v1314_v24  ;;  %v1315_v16 = vmul.f32 %v1799_v21, %v2568_v28 }
 0x308   : > { %1455 = vst [vmem:[#allocation2 + $0x58] sm:$0xff] %v1439_v33 }
 0x309   : > { %v1385_v37 = vmax.f32 %v1352_v55, 0.0  ;;  %v1353_v41 = vadd.f32 %v2656_v7, %v1315_v16  ;;  %v1800_v44 = vpop.f32.mrb[36].mxu1 }
 0x30a   : > { %v1801_v26 = vpop.f32.mrb[37].mxu1 }
 0x30b   : > { %v1386_v9 = vmax.f32 %v1353_v41, 0.0  ;;  %v1802_v47 = vadd.f32 %v1801_v26, %v1800_v44  ;;  %v1803_v49 = vpop.f32.mrb[38].mxu1  ;;  %v2836_v27 = vsel %vm2664_vm0, %v1385_v37, %v1352_v55 }
 0x30c   : > { %v1804_v17 = vpop.f32.mrb[39].mxu1  ;;  %1488 = vst [vmem:[#allocation12 + $0xc0] sm:$0xff] (!%p1676_p1), %v2836_v27 }
 0x30d   : > { %v2840_v43 = vsel %vm2664_vm0, %v1386_v9, %v1353_v41  ;;  %v1316_v28 = vmul.f32 %v1802_v47, %v2574_v31  ;;  %v1805_v34 = vadd.f32 %v1804_v17, %v1803_v49 }
 0x30e   : > { %v1440_v10 = vpack.c.bf16 %v2840_v43, %v2836_v27  ;;  %1489 = vst [vmem:[#allocation12 + $0xc8] sm:$0xff] (!%p1676_p1), %v2840_v43 }
 0x30f   : > { %v1354_v22 = vadd.f32 %v2656_v7, %v1316_v28  ;;  %v1317_v20 = vmul.f32 %v1805_v34, %v2576_v32 }
 0x310   : > { %1456 = vst [vmem:[#allocation2 + $0x60] sm:$0xff] %v1440_v10 }
 0x311   : > { %v1387_v18 = vmax.f32 %v1354_v22, 0.0  ;;  %v1355_v29 = vadd.f32 %v2656_v7, %v1317_v20  ;;  %v1806_v36 = vpop.f32.mrb[40].mxu1 }
 0x312   : > { %v1807_v11 = vpop.f32.mrb[41].mxu1 }
 0x313   : > { %v1388_v56 = vmax.f32 %v1355_v29, 0.0  ;;  %v1808_v61 = vadd.f32 %v1807_v11, %v1806_v36  ;;  %v1809_v63 = vpop.f32.mrb[42].mxu1  ;;  %v1422_v31 = vsel %vm2664_vm0, %v1387_v18, %v1354_v22 }
 0x314   : > { %v1810_v6 = vpop.f32.mrb[43].mxu1  ;;  %1490 = vst [vmem:[#allocation12 + $0xd0] sm:$0xff] (!%p1676_p1), %v1422_v31 }
 0x315   : > { %v1423_v3 = vsel %vm2664_vm0, %v1388_v56, %v1355_v29  ;;  %v1318_v5 = vmul.f32 %v1808_v61, %v2588_v45  ;;  %v1811_v4 = vadd.f32 %v1810_v6, %v1809_v63 }
 0x316   : > { %v1441_v32 = vpack.c.bf16 %v1423_v3, %v1422_v31  ;;  %1491 = vst [vmem:[#allocation12 + $0xd8] sm:$0xff] (!%p1676_p1), %v1423_v3 }
 0x317   : > { %v1356_v12 = vadd.f32 %v2656_v7, %v1318_v5  ;;  %v1319_v24 = vmul.f32 %v1811_v4, %v2590_v46 }
 0x318   : > { %1457 = vst [vmem:[#allocation2 + $0x68] sm:$0xff] %v1441_v32 }
 0x319   : > { %v1389_v21 = vmax.f32 %v1356_v12, 0.0  ;;  %v1357_v33 = vadd.f32 %v2656_v7, %v1319_v24  ;;  %v1812_v55 = vpop.f32.mrb[44].mxu1 }
 0x31a   : > { %v1813_v16 = vpop.f32.mrb[45].mxu1 }
 0x31b   : > { %v1390_v37 = vmax.f32 %v1357_v33, 0.0  ;;  %v1814_v41 = vadd.f32 %v1813_v16, %v1812_v55  ;;  %v1815_v44 = vpop.f32.mrb[46].mxu1  ;;  %v1424_v9 = vsel %vm2664_vm0, %v1389_v21, %v1356_v12 }
 0x31c   : > { %v1816_v26 = vpop.f32.mrb[47].mxu1  ;;  %1492 = vst [vmem:[#allocation12 + $0xe0] sm:$0xff] (!%p1676_p1), %v1424_v9 }
 0x31d   : > { %v1425_v45 = vsel %vm2664_vm0, %v1390_v37, %v1357_v33  ;;  %v1320_v47 = vmul.f32 %v1814_v41, %v2602_v62  ;;  %v1817_v49 = vadd.f32 %v1816_v26, %v1815_v44 }
 0x31e   : > { %v1442_v46 = vpack.c.bf16 %v1425_v45, %v1424_v9  ;;  %1493 = vst [vmem:[#allocation12 + $0xe8] sm:$0xff] (!%p1676_p1), %v1425_v45 }
 0x31f   : > { %v1358_v17 = vadd.f32 %v2656_v7, %v1320_v47  ;;  %v1321_v28 = vmul.f32 %v1817_v49, %v2606_v2 }
 0x320   : > { %1458 = vst [vmem:[#allocation2 + $0x70] sm:$0xff] %v1442_v46 }
 0x321   : > { %v1391_v34 = vmax.f32 %v1358_v17, 0.0  ;;  %v1359_v10 = vadd.f32 %v2656_v7, %v1321_v28 }
 0x322   : > { %1463 = sbr.rel (%p1676_p1) target bundleno = 809 (0x329), region = 68 }
 0x323   : > { %v1392_v22 = vmax.f32 %v1359_v10, 0.0  ;;  %v1426_v20 = vsel %vm2664_vm0, %v1391_v34, %v1358_v17 }
 0x324   : > { %1494 = vst [vmem:[#allocation12 + $0xf0] sm:$0xff] (!%p1676_p1), %v1426_v20 }
 0x325   : > { %v1427_v18 = vsel %vm2664_vm0, %v1392_v22, %v1359_v10 }
 0x326   : > { %v1443_v29 = vpack.c.bf16 %v1427_v18, %v1426_v20  ;;  %1495 = vst [vmem:[#allocation12 + $0xf8] sm:$0xff] (!%p1676_p1), %v1427_v18 }
 0x328   : > { %1459 = vst [vmem:[#allocation2 + $0x78] sm:$0xff] %v1443_v29 }
 0x329 PF: > { %p1926_p10 = scmp.eq.s32.totalorder %s2325_s22, 1  ;;  %s2273_s3 = smov [#allocation12]  }
 0x32a   : > { %s1502_s30 = sshll.u32 %s2273_s3, 4  ;;  %s1503_s30 = int_to_ptr.vmem [resolvable:$true] %s1502_s30 }
 0x32b   : > { %s2189_s11 = scalar_lea.vmem %s1503_s30, 4096  ;;  %p2196_p8 = scmp.lt.s32.totalorder %s1503_s30, %s1503_s30 }
 0x32c   : > { %p2190_p13 = scmp.ne.s32.totalorder %s1503_s30, %s2189_s11  ;;  %p2197_p4 = scmp.lt.s32.totalorder %s2189_s11, %s2189_s11 }
 0x32e   : > { %p2191_p2 = pnand %p2190_p13, %p1926_p10  ;;  %p2198_p6 = por %p2197_p4, %p2196_p8 }
 0x330   : > { %p2192_p5 = pneg %p2191_p2 }
 0x332   : > { %p2199_p9 = pnand %p2198_p6, %p2192_p5 }
 0x334   : > { %2202 = shalt.err (!%p2199_p9)
}
 0x335   : > { %s2203_s27 = scalar_lea.hbm %s2936_s5, 4096 }
 0x336   : > { %p2204_p12 = scmp.ne.s32.totalorder %s2936_s5, %s2203_s27  ;;  %p2209_p3 = scmp.lt.u32.totalorder %s2203_s27, %s2936_s5 }
 0x338   : > { %p2205_p0 = pnand %p2204_p12, %p1926_p10 }
 0x33a   : > { %p2206_p11 = pneg %p2205_p0 }
 0x33c   : > { %p2211_p7 = pnand %p2209_p3, %p2206_p11 }
 0x33e   : > { %2214 = shalt.err (!%p2211_p7)
}
 0x33f   : > { %s2274_s6 = smov 128   ;;  %s2275_s14 = smov 8  }
 0x340   : > { %1899 = dma.vmem_to_hbm [thread:$0]  (%p1926_p10), %s1503_s30, 4096, %s2936_s5, [#allocation5], %s2274_s6, %s2274_s6, %s2275_s14  }
 0x341   : > { %2244 = dma.done.wait (%p1926_p10), [#allocation5], 4096  }
 0x342   : > { %2246 = vsyncadd (%p1926_p10), [#allocation5], 4294963200 }
 0x343 PF: > { %p18_p1 = scmp.ge.s32.totalorder %s2351_s28, 4   ;;  %s2969_s18 = smov %s2253_s19 }
 0x344   : > { %s2970_s19 = smov %s2257_s20  ;;  %s2971_s20 = smov %s2388_s25 }
 0x345   : > { %s2972_s21 = smov %s2351_s28  ;;  %20 = sbr.rel (!%p18_p1) target bundleno = 9 (0x9), region = 109 }
 0x34c   :  { %1518 = vsyncpa [#allocation4], 1 }
 0x34d   :  { %1520 = vsyncpa [#allocation4 + $0x1], 1 }
 0x34e   :  { %1521 = vsyncpa [#allocation7], 1 }
 0x34f   :  { %1522 = vsyncpa [#allocation10], 1 }
 0x350   :  { %1524 = vsyncpa [#allocation10 + $0x1], 1 }
 0x351   :  { %1525 = vsyncpa [#allocation5], 1 }
 0x352   :  { %1527 = vsyncpa [#allocation5 + $0x1], 1 }

</bundles_post_ra>
